<compile_context>
chip_gen: v7x
topology: tpu7x:2x2x1
jax: 0.10.0
libtpu: 0.0.40
codegen_flags: <defaults>
</compile_context>

<pallas_src>
import jax
import jax.numpy as jnp
import numpy as np
from jax.experimental import pallas as pl
from jax.experimental.pallas import tpu as pltpu

LANE = 128
_BN_EPS = 1e-5


def _round_up(x, m):
    return ((x + m - 1) // m) * m


def _vmem_budget_bytes():
    """Generation-aware scoped-VMEM budget: ~75% of physical VMEM, capped at
    96 MiB (v5e/v6e: 128 MiB -> 96 MiB, v7x: 64 MiB -> 48 MiB); conservative
    64 MiB assumption if the hardware query is unavailable."""
    cap = 64 << 20
    try:
        info = pltpu.get_tpu_info()
        cap = int(getattr(info, "vmem_capacity_bytes", cap) or cap)
    except Exception:
        pass
    return min((cap * 3) // 4, 96 << 20)


def _pick_bt(B, N, cmax, vmem_budget):
    """Largest batch tile (graphs per grid step, <= 8) whose double-buffered
    blocks + resident weights fit the VMEM budget; prefer >= 2 grid steps so
    both TensorCores are fed on v7x."""
    def fits(bt):
        streamed = bt * N * (4 * cmax      # layer input (f32 worst case, layer 1)
                             + 2 * N       # adjacency (bf16)
                             + 4           # inv_deg (f32)
                             + 2 * cmax    # activation out (bf16)
                             + 8 * cmax)   # final-linear partial in+out (f32)
        weights = 3 * cmax * cmax * 2 * 2  # wr / wo / wl resident (bf16, 2 bufs)
        scratch = 3 * bt * N * cmax * 4    # f32 in-kernel intermediates headroom
        return 2 * streamed + weights + scratch <= int(vmem_budget * 0.8)

    cands = [d for d in range(1, min(B, 8) + 1) if B % d == 0 and fits(d)]
    if not cands:
        return 1
    pref = [d for d in cands if B // d >= 2]
    return max(pref) if pref else max(cands)


# ---------------------------------------------------------------------------
# Kernel A (used 3x): fused [apply folded BN] -> DenseSAGEConv -> ReLU
#                     -> per-tile BN statistics [-> final-linear partial]
# ---------------------------------------------------------------------------
def _make_sage_kernel(emit_partial, has_partial_in):
    def kernel(*refs):
        it = iter(refs)
        z_ref, adj_ref, invd_ref = next(it), next(it), next(it)
        a_ref, c_ref = next(it), next(it)
        wr_ref, wo_ref, b_ref = next(it), next(it), next(it)
        wl_ref = next(it) if emit_partial else None
        yin_ref = next(it) if has_partial_in else None
        zout_ref, stats_ref = next(it), next(it)
        yout_ref = next(it) if emit_partial else None

        bt, n, cin = z_ref.shape
        cout = wr_ref.shape[1]
        rows = bt * n

        # Folded BatchNorm of the *previous* layer (identity for layer 1):
        #   h = z * a + c  with  a = gamma*rsqrt(var+eps),  c = beta - mean*a
        h = z_ref[...].astype(jnp.float32) * a_ref[...] + c_ref[...]   # (bt,n,cin) f32
        h_bf = h.astype(jnp.bfloat16)

        # Mean neighbor aggregation: batched MXU matmul, f32 accumulation.
        # adj is 0/1 so the bf16 representation is exact; inv_deg is exact f32.
        agg = jnp.einsum('bij,bjc->bic', adj_ref[...], h_bf,
                         preferred_element_type=jnp.float32) * invd_ref[...]

        h2 = h_bf.reshape(rows, cin)
        agg2 = agg.reshape(rows, cin).astype(jnp.bfloat16)
        z = (jnp.dot(agg2, wr_ref[...], preferred_element_type=jnp.float32)
             + jnp.dot(h2, wo_ref[...], preferred_element_type=jnp.float32)
             + b_ref[...])
        z = jnp.maximum(z, 0.0)                                        # ReLU (f32)

        zout_ref[...] = z.reshape(bt, n, cout).astype(zout_ref.dtype)  # bf16 store

        # Streaming BatchNorm statistics for this tile: row 0 = sum, row 1 = sumsq.
        s = jnp.sum(z, axis=0, keepdims=True)
        sq = jnp.sum(z * z, axis=0, keepdims=True)
        stats_ref[...] = jnp.concatenate([s, sq], axis=0)

        # Fused final-Linear partial: y_partial (+)= BN(z_prev) @ wl_prev.
        if emit_partial:
            op = wl_ref.shape[1]
            yp = jnp.dot(h2, wl_ref[...], preferred_element_type=jnp.float32)
            if has_partial_in:
                yp = yp + yin_ref[...].reshape(rows, op)
            yout_ref[...] = yp.reshape(bt, n, op)
    return kernel


def _sage_layer(z, adj_bf, inv_deg, a, c, wr, wo, b,
                wl_prev=None, y_in=None, *, bt, vmem_limit):
    B, N, Cin = z.shape
    Cout = wr.shape[1]
    G = B // bt
    emit_partial = wl_prev is not None
    has_partial_in = y_in is not None

    def act3(i):
        return (i, 0, 0)

    def par2(i):
        return (0, 0)

    in_specs = [
        pl.BlockSpec((bt, N, Cin), act3),     # previous activation (bf16/f32)
        pl.BlockSpec((bt, N, N), act3),       # adjacency (bf16)
        pl.BlockSpec((bt, N, 1), act3),       # 1 / clamp(deg, 1)  (f32)
        pl.BlockSpec((1, Cin), par2),         # folded BN scale
        pl.BlockSpec((1, Cin), par2),         # folded BN shift
        pl.BlockSpec((Cin, Cout), par2),      # W_rel (bf16)
        pl.BlockSpec((Cin, Cout), par2),      # W_root (bf16)
        pl.BlockSpec((1, Cout), par2),        # bias
    ]
    inputs = [z, adj_bf, inv_deg, a, c, wr, wo, b]
    if emit_partial:
        Op = wl_prev.shape[1]
        in_specs.append(pl.BlockSpec((Cin, Op), par2))
        inputs.append(wl_prev)
    if has_partial_in:
        in_specs.append(pl.BlockSpec((bt, N, y_in.shape[-1]), act3))
        inputs.append(y_in)

    out_specs = [
        pl.BlockSpec((bt, N, Cout), act3),    # relu(conv) activation (bf16)
        pl.BlockSpec((None, 2, Cout), act3),  # per-tile sum / sumsq (f32)
    ]
    out_shape = [
        jax.ShapeDtypeStruct((B, N, Cout), jnp.bfloat16),
        jax.ShapeDtypeStruct((G, 2, Cout), jnp.float32),
    ]
    if emit_partial:
        Op = wl_prev.shape[1]
        out_specs.append(pl.BlockSpec((bt, N, Op), act3))
        out_shape.append(jax.ShapeDtypeStruct((B, N, Op), jnp.float32))

    return pl.pallas_call(
        _make_sage_kernel(emit_partial, has_partial_in),
        grid=(G,),
        in_specs=in_specs,
        out_specs=out_specs,
        out_shape=out_shape,
        compiler_params=pltpu.CompilerParams(
            dimension_semantics=("parallel",),
            vmem_limit_bytes=vmem_limit),
    )(*inputs)


# ---------------------------------------------------------------------------
# Kernel B: final epilogue — y = relu(partial + BN(z3) @ wl3 + bl)
# ---------------------------------------------------------------------------
def _final_kernel(z3_ref, yp_ref, a3_ref, c3_ref, wl3_ref, bl_ref, out_ref):
    bt, n, op = z3_ref.shape
    rows = bt * n
    h3 = z3_ref[...].astype(jnp.float32) * a3_ref[...] + c3_ref[...]
    h2 = h3.reshape(rows, op).astype(jnp.bfloat16)
    y = (yp_ref[...].reshape(rows, op)
         + jnp.dot(h2, wl3_ref[...], preferred_element_type=jnp.float32)
         + bl_ref[...])
    out_ref[...] = jnp.maximum(y, 0.0).reshape(bt, n, op)


def _final_linear(z3, y_partial, a3, c3, wl3, bl, *, bt, vmem_limit):
    B, N, Op = z3.shape
    G = B // bt

    def act3(i):
        return (i, 0, 0)

    def par2(i):
        return (0, 0)

    return pl.pallas_call(
        _final_kernel,
        grid=(G,),
        in_specs=[
            pl.BlockSpec((bt, N, Op), act3),
            pl.BlockSpec((bt, N, Op), act3),
            pl.BlockSpec((1, Op), par2),
            pl.BlockSpec((1, Op), par2),
            pl.BlockSpec((Op, Op), par2),
            pl.BlockSpec((1, Op), par2),
        ],
        out_specs=pl.BlockSpec((bt, N, Op), act3),
        out_shape=jax.ShapeDtypeStruct((B, N, Op), jnp.float32),
        compiler_params=pltpu.CompilerParams(
            dimension_semantics=("parallel",),
            vmem_limit_bytes=vmem_limit),
    )(z3, y_partial, a3, c3, wl3, bl)


# ---------------------------------------------------------------------------
# Host-side helpers
# ---------------------------------------------------------------------------
def _fold_bn(stats, gamma, beta, count):
    """Reduce per-tile (sum, sumsq) into BatchNorm scale/shift: BN(z) = z*a + c."""
    s = jnp.sum(stats[:, 0, :], axis=0)
    sq = jnp.sum(stats[:, 1, :], axis=0)
    mean = s / count
    var = jnp.maximum(sq / count - mean * mean, 0.0)   # biased (training-mode)
    a = gamma * jax.lax.rsqrt(var + _BN_EPS)
    c = beta - mean * a
    return a, c


def _prepare_params(p):
    """Zero-pad channels to multiples of 128 lanes; weights cast to bf16."""
    in_c, hid = p['wr1'].shape
    out_c = p['wr3'].shape[1]
    ci, hp, op = _round_up(in_c, LANE), _round_up(hid, LANE), _round_up(out_c, LANE)

    def wpad(w, r, c):
        return jnp.pad(w, ((0, r - w.shape[0]), (0, c - w.shape[1]))).astype(jnp.bfloat16)

    def vpad(v, c):
        return jnp.pad(v, (0, c - v.shape[0])).reshape(1, c).astype(jnp.float32)

    return dict(
        ci=ci, hp=hp, op=op,
        wr1=wpad(p['wr1'], ci, hp), wo1=wpad(p['wo1'], ci, hp), b1=vpad(p['b1'], hp),
        g1=vpad(p['g1'], hp), be1=vpad(p['be1'], hp),
        wr2=wpad(p['wr2'], hp, hp), wo2=wpad(p['wo2'], hp, hp), b2=vpad(p['b2'], hp),
        g2=vpad(p['g2'], hp), be2=vpad(p['be2'], hp),
        wr3=wpad(p['wr3'], hp, op), wo3=wpad(p['wo3'], hp, op), b3=vpad(p['b3'], op),
        g3=vpad(p['g3'], op), be3=vpad(p['be3'], op),
        wl1=wpad(p['wl1'], hp, op), wl2=wpad(p['wl2'], hp, op),
        wl3=wpad(p['wl3'], op, op), bl=vpad(p['bl'], op),
    )


def gnn_forward(x, adj, params):
    B, N, in_c = x.shape
    assert N % 16 == 0, "node dim must be a multiple of 16 (bf16 sublane packing)"
    # TODO(synk): the `mask` argument and masked node padding are not implemented;
    # this reproduces the mask=None forward path (padded nodes would otherwise
    # contaminate degrees and BatchNorm statistics).
    p = _prepare_params(params)
    ci, hp, op = p['ci'], p['hp'], p['op']
    out_c = params['bl'].shape[-1]

    vmem_limit = _vmem_budget_bytes()
    bt = _pick_bt(B, N, max(ci, hp, op), vmem_limit)

    xp = jnp.pad(x, ((0, 0), (0, 0), (0, ci - in_c)))
    adj_bf = adj.astype(jnp.bfloat16)                       # 0/1 -> exact in bf16
    inv_deg = 1.0 / jnp.maximum(jnp.sum(adj, axis=-1, keepdims=True), 1.0)  # exact
    count = float(B * N)

    ident_a = jnp.ones((1, ci), jnp.float32)                # layer-1 "BN" = identity
    ident_c = jnp.zeros((1, ci), jnp.float32)

    z1, st1 = _sage_layer(xp, adj_bf, inv_deg, ident_a, ident_c,
                          p['wr1'], p['wo1'], p['b1'], bt=bt, vmem_limit=vmem_limit)
    a1, c1 = _fold_bn(st1, p['g1'], p['be1'], count)

    z2, st2, yp = _sage_layer(z1, adj_bf, inv_deg, a1, c1,
                              p['wr2'], p['wo2'], p['b2'],
                              wl_prev=p['wl1'], bt=bt, vmem_limit=vmem_limit)
    a2, c2 = _fold_bn(st2, p['g2'], p['be2'], count)

    z3, st3, yp = _sage_layer(z2, adj_bf, inv_deg, a2, c2,
                              p['wr3'], p['wo3'], p['b3'],
                              wl_prev=p['wl2'], y_in=yp, bt=bt, vmem_limit=vmem_limit)
    a3, c3 = _fold_bn(st3, p['g3'], p['be3'], count)

    y = _final_linear(z3, yp, a3, c3, p['wl3'], p['bl'], bt=bt, vmem_limit=vmem_limit)
    return y[..., :out_c]


def init_params(key, in_c, hid, out_c):
    ks = jax.random.split(key, 19)

    def w(k, ci, co, scale=0.1):
        return (scale * jax.random.normal(k, (ci, co))).astype(jnp.float32)

    def v(k, c, scale=0.05):
        return (scale * jax.random.normal(k, (c,))).astype(jnp.float32)

    return {
        'wr1': w(ks[0], in_c, hid), 'wo1': w(ks[1], in_c, hid), 'b1': v(ks[2], hid),
        'g1': 1.0 + v(ks[3], hid), 'be1': v(ks[4], hid),
        'wr2': w(ks[5], hid, hid), 'wo2': w(ks[6], hid, hid), 'b2': v(ks[7], hid),
        'g2': 1.0 + v(ks[8], hid), 'be2': v(ks[9], hid),
        'wr3': w(ks[10], hid, out_c), 'wo3': w(ks[11], hid, out_c), 'b3': v(ks[12], out_c),
        'g3': 1.0 + v(ks[13], out_c), 'be3': v(ks[14], out_c),
        'wl1': w(ks[15], hid, out_c), 'wl2': w(ks[16], hid, out_c),
        'wl3': w(ks[17], out_c, out_c), 'bl': v(ks[18], out_c),
    }


def gnn_reference(x, adj, p):
    """Pure-JAX reference with identical module semantics, mirroring the
    kernel's mixed precision (bf16 MXU inputs, bf16-stored activations, f32
    accumulation, streaming-moments variance) so the comparison is tight."""
    bf = jnp.bfloat16
    inv_deg = 1.0 / jnp.maximum(jnp.sum(adj, axis=-1, keepdims=True), 1.0)
    adj_bf = adj.astype(bf)

    def mm(a, w):
        return jnp.einsum('bnc,cd->bnd', a.astype(bf), w.astype(bf),
                          preferred_element_type=jnp.float32)

    def sage(h, wr, wo, b):
        h_bf = h.astype(bf)
        agg = jnp.einsum('bij,bjc->bic', adj_bf, h_bf,
                         preferred_element_type=jnp.float32) * inv_deg
        return mm(agg, wr) + mm(h, wo) + b

    def relu_bn(zf, g, be):
        z = jnp.maximum(zf, 0.0)
        m = z.mean(axis=(0, 1))
        var = jnp.maximum((z * z).mean(axis=(0, 1)) - m * m, 0.0)
        a = g * jax.lax.rsqrt(var + _BN_EPS)
        c = be - m * a
        z_stored = z.astype(bf).astype(jnp.float32)     # mirrors bf16 activation storage
        return z_stored * a + c

    h1 = relu_bn(sage(x, p['wr1'], p['wo1'], p['b1']), p['g1'], p['be1'])
    h2 = relu_bn(sage(h1, p['wr2'], p['wo2'], p['b2']), p['g2'], p['be2'])
    h3 = relu_bn(sage(h2, p['wr3'], p['wo3'], p['b3']), p['g3'], p['be3'])
    y = mm(h1, p['wl1']) + mm(h2, p['wl2']) + mm(h3, p['wl3']) + p['bl']
    return jnp.maximum(y, 0.0)


if __name__ == "__main__":
    key = jax.random.PRNGKey(0)
    k_x, k_adj, k_p = jax.random.split(key, 3)

    B, N = 2, 16
    in_channels, hidden_channels, out_channels = 8, 32, 16

    x = jax.random.normal(k_x, (B, N, in_channels), dtype=jnp.float32)
    adj = (jax.random.uniform(k_adj, (B, N, N)) < 0.3).astype(jnp.float32)
    params = init_params(k_p, in_channels, hidden_channels, out_channels)

    fwd = jax.jit(gnn_forward)
    out = jax.block_until_ready(fwd(x, adj, params))
    ref = jax.block_until_ready(gnn_reference(x, adj, params))

    # bf16 matmul inputs / bf16 activation storage are mirrored by the reference;
    # remaining drift is f32 accumulation-order + rare bf16 rounding-boundary flips.
    np.testing.assert_allclose(np.asarray(out), np.asarray(ref), rtol=1e-2, atol=1e-2)

    print("KERNEL_OK")
</pallas_src>

<mosaic_0001>
module attributes {stable_mosaic.version = 11 : i64} {
  func.func @kernel(%arg0: i32, %arg1: memref<1x16x128xf32, #tpu.memory_space<vmem>>, %arg2: memref<1x16x16xbf16, #tpu.memory_space<vmem>>, %arg3: memref<1x16x1xf32, #tpu.memory_space<vmem>>, %arg4: memref<1x128xf32, #tpu.memory_space<vmem>>, %arg5: memref<1x128xf32, #tpu.memory_space<vmem>>, %arg6: memref<128x128xbf16, #tpu.memory_space<vmem>>, %arg7: memref<128x128xbf16, #tpu.memory_space<vmem>>, %arg8: memref<1x128xf32, #tpu.memory_space<vmem>>, %arg9: memref<1x16x128xbf16, #tpu.memory_space<vmem>>, %arg10: memref<1x2x128xf32, #tpu.memory_space<vmem>>) attributes {dimension_semantics = [#tpu.dimension_semantics<parallel>], iteration_bounds = array<i64: 2>, scalar_prefetch = 0 : i64, scratch_operands = 0 : i64, tpu.core_type = #tpu.core_type<tc>, window_params = [{transform_indices = @transform_0, window_bounds = array<i64: 1, 16, 128>}, {transform_indices = @transform_1, window_bounds = array<i64: 1, 16, 16>}, {transform_indices = @transform_2, window_bounds = array<i64: 1, 16, 1>}, {pipeline_mode = #tpu.pipeline_mode<synchronous>, transform_indices = @transform_3, window_bounds = array<i64: 1, 128>}, {pipeline_mode = #tpu.pipeline_mode<synchronous>, transform_indices = @transform_4, window_bounds = array<i64: 1, 128>}, {pipeline_mode = #tpu.pipeline_mode<synchronous>, transform_indices = @transform_5, window_bounds = array<i64: 128, 128>}, {pipeline_mode = #tpu.pipeline_mode<synchronous>, transform_indices = @transform_6, window_bounds = array<i64: 128, 128>}, {pipeline_mode = #tpu.pipeline_mode<synchronous>, transform_indices = @transform_7, window_bounds = array<i64: 1, 128>}, {transform_indices = @transform_8, window_bounds = array<i64: 1, 16, 128>}, {transform_indices = @transform_9, window_bounds = array<i64: 1, 2, 128>}]} {
    %c0 = arith.constant 0 : index
    %c0_0 = arith.constant 0 : index
    %c0_1 = arith.constant 0 : index
    %0 = vector.load %arg1[%c0, %c0_0, %c0_1] : memref<1x16x128xf32, #tpu.memory_space<vmem>>, vector<1x16x128xf32>
    %c0_2 = arith.constant 0 : index
    %c0_3 = arith.constant 0 : index
    %1 = vector.load %arg4[%c0_2, %c0_3] : memref<1x128xf32, #tpu.memory_space<vmem>>, vector<1x128xf32>
    %2 = vector.shape_cast %1 : vector<1x128xf32> to vector<1x1x128xf32>
    %3 = vector.broadcast %2 : vector<1x1x128xf32> to vector<1x16x128xf32>
    %4 = arith.mulf %0, %3 : vector<1x16x128xf32>
    %c0_4 = arith.constant 0 : index
    %c0_5 = arith.constant 0 : index
    %5 = vector.load %arg5[%c0_4, %c0_5] : memref<1x128xf32, #tpu.memory_space<vmem>>, vector<1x128xf32>
    %6 = vector.shape_cast %5 : vector<1x128xf32> to vector<1x1x128xf32>
    %7 = vector.broadcast %6 : vector<1x1x128xf32> to vector<1x16x128xf32>
    %8 = arith.addf %4, %7 : vector<1x16x128xf32>
    %9 = arith.truncf %8 : vector<1x16x128xf32> to vector<1x16x128xbf16>
    %c0_6 = arith.constant 0 : index
    %c0_7 = arith.constant 0 : index
    %c0_8 = arith.constant 0 : index
    %10 = vector.load %arg2[%c0_6, %c0_7, %c0_8] : memref<1x16x16xbf16, #tpu.memory_space<vmem>>, vector<1x16x16xbf16>
    "tpu.trace_start"() <{level = 10 : i32, message = "bij,bjc->bic"}> : () -> ()
    %cst = arith.constant dense<0.000000e+00> : vector<1x16x128xf32>
    %11 = tpu.matmul %10, %9, %cst {dimension_numbers = #tpu.dot_dimension_numbers<[2], [1], [1], [2], [0, 0, 0, 1, 1, 2], [0], [0]>} : vector<1x16x16xbf16>, vector<1x16x128xbf16>, vector<1x16x128xf32> -> vector<1x16x128xf32>
    "tpu.trace_stop"() : () -> ()
    %c0_9 = arith.constant 0 : index
    %c0_10 = arith.constant 0 : index
    %c0_11 = arith.constant 0 : index
    %12 = vector.load %arg3[%c0_9, %c0_10, %c0_11] : memref<1x16x1xf32, #tpu.memory_space<vmem>>, vector<1x16x1xf32>
    %13 = vector.broadcast %12 : vector<1x16x1xf32> to vector<1x16x128xf32>
    %14 = arith.mulf %11, %13 : vector<1x16x128xf32>
    %15 = vector.shape_cast %9 : vector<1x16x128xbf16> to vector<16x128xbf16>
    %16 = vector.shape_cast %14 : vector<1x16x128xf32> to vector<16x128xf32>
    %17 = arith.truncf %16 : vector<16x128xf32> to vector<16x128xbf16>
    %c0_12 = arith.constant 0 : index
    %c0_13 = arith.constant 0 : index
    %18 = vector.load %arg6[%c0_12, %c0_13] : memref<128x128xbf16, #tpu.memory_space<vmem>>, vector<128x128xbf16>
    %cst_14 = arith.constant dense<0.000000e+00> : vector<16x128xf32>
    %19 = tpu.matmul %17, %18, %cst_14 {dimension_numbers = #tpu.dot_dimension_numbers<[1], [0], [0], [1], [0, 0, 1, 1], [], []>} : vector<16x128xbf16>, vector<128x128xbf16>, vector<16x128xf32> -> vector<16x128xf32>
    %c0_15 = arith.constant 0 : index
    %c0_16 = arith.constant 0 : index
    %20 = vector.load %arg7[%c0_15, %c0_16] : memref<128x128xbf16, #tpu.memory_space<vmem>>, vector<128x128xbf16>
    %cst_17 = arith.constant dense<0.000000e+00> : vector<16x128xf32>
    %21 = tpu.matmul %15, %20, %cst_17 {dimension_numbers = #tpu.dot_dimension_numbers<[1], [0], [0], [1], [0, 0, 1, 1], [], []>} : vector<16x128xbf16>, vector<128x128xbf16>, vector<16x128xf32> -> vector<16x128xf32>
    %22 = arith.addf %19, %21 : vector<16x128xf32>
    %c0_18 = arith.constant 0 : index
    %c0_19 = arith.constant 0 : index
    %23 = vector.load %arg8[%c0_18, %c0_19] : memref<1x128xf32, #tpu.memory_space<vmem>>, vector<1x128xf32>
    %24 = vector.broadcast %23 : vector<1x128xf32> to vector<16x128xf32>
    %25 = arith.addf %22, %24 : vector<16x128xf32>
    %cst_20 = arith.constant 0.000000e+00 : f32
    %26 = vector.broadcast %cst_20 : f32 to vector<16x128xf32>
    %27 = arith.maximumf %25, %26 : vector<16x128xf32>
    %28 = vector.shape_cast %27 : vector<16x128xf32> to vector<1x16x128xf32>
    %29 = arith.truncf %28 : vector<1x16x128xf32> to vector<1x16x128xbf16>
    %c0_21 = arith.constant 0 : index
    %c0_22 = arith.constant 0 : index
    %c0_23 = arith.constant 0 : index
    %30 = vector.load %arg9[%c0_21, %c0_22, %c0_23] : memref<1x16x128xbf16, #tpu.memory_space<vmem>>, vector<1x16x128xbf16>
    tpu.vector_store %arg9[%c0_21, %c0_22, %c0_23], %29 {strides = array<i32>} : memref<1x16x128xbf16, #tpu.memory_space<vmem>>, vector<1x16x128xbf16>,
    %cst_24 = arith.constant dense<0.000000e+00> : vector<128xf32>
    %31 = vector.multi_reduction <add>, %27, %cst_24 [0] : vector<16x128xf32> to vector<128xf32>
    %32 = vector.shape_cast %31 : vector<128xf32> to vector<1x128xf32>
    %33 = arith.mulf %27, %27 : vector<16x128xf32>
    %cst_25 = arith.constant dense<0.000000e+00> : vector<128xf32>
    %34 = vector.multi_reduction <add>, %33, %cst_25 [0] : vector<16x128xf32> to vector<128xf32>
    %35 = vector.shape_cast %34 : vector<128xf32> to vector<1x128xf32>
    %36 = tpu.concatenate %32, %35 in 0 : vector<1x128xf32>, vector<1x128xf32> -> vector<2x128xf32>
    %c0_26 = arith.constant 0 : index
    %c0_27 = arith.constant 0 : index
    %c0_28 = arith.constant 0 : index
    %37 = vector.load %arg10[%c0_26, %c0_27, %c0_28] : memref<1x2x128xf32, #tpu.memory_space<vmem>>, vector<1x2x128xf32>
    %38 = vector.shape_cast %37 : vector<1x2x128xf32> to vector<2x128xf32>
    %39 = vector.shape_cast %36 : vector<2x128xf32> to vector<1x2x128xf32>
    tpu.vector_store %arg10[%c0_26, %c0_27, %c0_28], %39 {strides = array<i32>} : memref<1x2x128xf32, #tpu.memory_space<vmem>>, vector<1x2x128xf32>,
    return
  }
  func.func @transform_0(%arg0: i32) -> (i32, i32, i32) {
    %c0_i32 = arith.constant 0 : i32
    %c0_i32_0 = arith.constant 0 : i32
    %c0_i32_1 = arith.constant 0 : i32
    return %arg0, %c0_i32, %c0_i32_0 : i32, i32, i32
  }
  func.func @transform_1(%arg0: i32) -> (i32, i32, i32) {
    %c0_i32 = arith.constant 0 : i32
    %c0_i32_0 = arith.constant 0 : i32
    %c0_i32_1 = arith.constant 0 : i32
    return %arg0, %c0_i32, %c0_i32_0 : i32, i32, i32
  }
  func.func @transform_2(%arg0: i32) -> (i32, i32, i32) {
    %c0_i32 = arith.constant 0 : i32
    %c0_i32_0 = arith.constant 0 : i32
    %c0_i32_1 = arith.constant 0 : i32
    return %arg0, %c0_i32, %c0_i32_0 : i32, i32, i32
  }
  func.func @transform_3(%arg0: i32) -> (i32, i32) {
    %c0_i32 = arith.constant 0 : i32
    %c0_i32_0 = arith.constant 0 : i32
    %c0_i32_1 = arith.constant 0 : i32
    return %c0_i32, %c0_i32_0 : i32, i32
  }
  func.func @transform_4(%arg0: i32) -> (i32, i32) {
    %c0_i32 = arith.constant 0 : i32
    %c0_i32_0 = arith.constant 0 : i32
    %c0_i32_1 = arith.constant 0 : i32
    return %c0_i32, %c0_i32_0 : i32, i32
  }
  func.func @transform_5(%arg0: i32) -> (i32, i32) {
    %c0_i32 = arith.constant 0 : i32
    %c0_i32_0 = arith.constant 0 : i32
    %c0_i32_1 = arith.constant 0 : i32
    return %c0_i32, %c0_i32_0 : i32, i32
  }
  func.func @transform_6(%arg0: i32) -> (i32, i32) {
    %c0_i32 = arith.constant 0 : i32
    %c0_i32_0 = arith.constant 0 : i32
    %c0_i32_1 = arith.constant 0 : i32
    return %c0_i32, %c0_i32_0 : i32, i32
  }
  func.func @transform_7(%arg0: i32) -> (i32, i32) {
    %c0_i32 = arith.constant 0 : i32
    %c0_i32_0 = arith.constant 0 : i32
    %c0_i32_1 = arith.constant 0 : i32
    return %c0_i32, %c0_i32_0 : i32, i32
  }
  func.func @transform_8(%arg0: i32) -> (i32, i32, i32) {
    %c0_i32 = arith.constant 0 : i32
    %c0_i32_0 = arith.constant 0 : i32
    %c0_i32_1 = arith.constant 0 : i32
    return %arg0, %c0_i32, %c0_i32_0 : i32, i32, i32
  }
  func.func @transform_9(%arg0: i32) -> (i32, i32, i32) {
    %c0_i32 = arith.constant 0 : i32
    %c0_i32_0 = arith.constant 0 : i32
    %c0_i32_1 = arith.constant 0 : i32
    return %arg0, %c0_i32, %c0_i32_0 : i32, i32, i32
  }
}

module attributes {stable_mosaic.version = 11 : i64} {
  func.func @kernel(%arg0: i32, %arg1: memref<1x16x128xbf16, #tpu.memory_space<vmem>>, %arg2: memref<1x16x16xbf16, #tpu.memory_space<vmem>>, %arg3: memref<1x16x1xf32, #tpu.memory_space<vmem>>, %arg4: memref<1x128xf32, #tpu.memory_space<vmem>>, %arg5: memref<1x128xf32, #tpu.memory_space<vmem>>, %arg6: memref<128x128xbf16, #tpu.memory_space<vmem>>, %arg7: memref<128x128xbf16, #tpu.memory_space<vmem>>, %arg8: memref<1x128xf32, #tpu.memory_space<vmem>>, %arg9: memref<128x128xbf16, #tpu.memory_space<vmem>>, %arg10: memref<1x16x128xbf16, #tpu.memory_space<vmem>>, %arg11: memref<1x2x128xf32, #tpu.memory_space<vmem>>, %arg12: memref<1x16x128xf32, #tpu.memory_space<vmem>>) attributes {dimension_semantics = [#tpu.dimension_semantics<parallel>], iteration_bounds = array<i64: 2>, scalar_prefetch = 0 : i64, scratch_operands = 0 : i64, tpu.core_type = #tpu.core_type<tc>, window_params = [{transform_indices = @transform_0, window_bounds = array<i64: 1, 16, 128>}, {transform_indices = @transform_1, window_bounds = array<i64: 1, 16, 16>}, {transform_indices = @transform_2, window_bounds = array<i64: 1, 16, 1>}, {pipeline_mode = #tpu.pipeline_mode<synchronous>, transform_indices = @transform_3, window_bounds = array<i64: 1, 128>}, {pipeline_mode = #tpu.pipeline_mode<synchronous>, transform_indices = @transform_4, window_bounds = array<i64: 1, 128>}, {pipeline_mode = #tpu.pipeline_mode<synchronous>, transform_indices = @transform_5, window_bounds = array<i64: 128, 128>}, {pipeline_mode = #tpu.pipeline_mode<synchronous>, transform_indices = @transform_6, window_bounds = array<i64: 128, 128>}, {pipeline_mode = #tpu.pipeline_mode<synchronous>, transform_indices = @transform_7, window_bounds = array<i64: 1, 128>}, {pipeline_mode = #tpu.pipeline_mode<synchronous>, transform_indices = @transform_8, window_bounds = array<i64: 128, 128>}, {transform_indices = @transform_9, window_bounds = array<i64: 1, 16, 128>}, {transform_indices = @transform_10, window_bounds = array<i64: 1, 2, 128>}, {transform_indices = @transform_11, window_bounds = array<i64: 1, 16, 128>}]} {
    %c0 = arith.constant 0 : index
    %c0_0 = arith.constant 0 : index
    %c0_1 = arith.constant 0 : index
    %0 = vector.load %arg1[%c0, %c0_0, %c0_1] : memref<1x16x128xbf16, #tpu.memory_space<vmem>>, vector<1x16x128xbf16>
    %1 = arith.extf %0 : vector<1x16x128xbf16> to vector<1x16x128xf32>
    %c0_2 = arith.constant 0 : index
    %c0_3 = arith.constant 0 : index
    %2 = vector.load %arg4[%c0_2, %c0_3] : memref<1x128xf32, #tpu.memory_space<vmem>>, vector<1x128xf32>
    %3 = vector.shape_cast %2 : vector<1x128xf32> to vector<1x1x128xf32>
    %4 = vector.broadcast %3 : vector<1x1x128xf32> to vector<1x16x128xf32>
    %5 = arith.mulf %1, %4 : vector<1x16x128xf32>
    %c0_4 = arith.constant 0 : index
    %c0_5 = arith.constant 0 : index
    %6 = vector.load %arg5[%c0_4, %c0_5] : memref<1x128xf32, #tpu.memory_space<vmem>>, vector<1x128xf32>
    %7 = vector.shape_cast %6 : vector<1x128xf32> to vector<1x1x128xf32>
    %8 = vector.broadcast %7 : vector<1x1x128xf32> to vector<1x16x128xf32>
    %9 = arith.addf %5, %8 : vector<1x16x128xf32>
    %10 = arith.truncf %9 : vector<1x16x128xf32> to vector<1x16x128xbf16>
    %c0_6 = arith.constant 0 : index
    %c0_7 = arith.constant 0 : index
    %c0_8 = arith.constant 0 : index
    %11 = vector.load %arg2[%c0_6, %c0_7, %c0_8] : memref<1x16x16xbf16, #tpu.memory_space<vmem>>, vector<1x16x16xbf16>
    "tpu.trace_start"() <{level = 10 : i32, message = "bij,bjc->bic"}> : () -> ()
    %cst = arith.constant dense<0.000000e+00> : vector<1x16x128xf32>
    %12 = tpu.matmul %11, %10, %cst {dimension_numbers = #tpu.dot_dimension_numbers<[2], [1], [1], [2], [0, 0, 0, 1, 1, 2], [0], [0]>} : vector<1x16x16xbf16>, vector<1x16x128xbf16>, vector<1x16x128xf32> -> vector<1x16x128xf32>
    "tpu.trace_stop"() : () -> ()
    %c0_9 = arith.constant 0 : index
    %c0_10 = arith.constant 0 : index
    %c0_11 = arith.constant 0 : index
    %13 = vector.load %arg3[%c0_9, %c0_10, %c0_11] : memref<1x16x1xf32, #tpu.memory_space<vmem>>, vector<1x16x1xf32>
    %14 = vector.broadcast %13 : vector<1x16x1xf32> to vector<1x16x128xf32>
    %15 = arith.mulf %12, %14 : vector<1x16x128xf32>
    %16 = vector.shape_cast %10 : vector<1x16x128xbf16> to vector<16x128xbf16>
    %17 = vector.shape_cast %15 : vector<1x16x128xf32> to vector<16x128xf32>
    %18 = arith.truncf %17 : vector<16x128xf32> to vector<16x128xbf16>
    %c0_12 = arith.constant 0 : index
    %c0_13 = arith.constant 0 : index
    %19 = vector.load %arg6[%c0_12, %c0_13] : memref<128x128xbf16, #tpu.memory_space<vmem>>, vector<128x128xbf16>
    %cst_14 = arith.constant dense<0.000000e+00> : vector<16x128xf32>
    %20 = tpu.matmul %18, %19, %cst_14 {dimension_numbers = #tpu.dot_dimension_numbers<[1], [0], [0], [1], [0, 0, 1, 1], [], []>} : vector<16x128xbf16>, vector<128x128xbf16>, vector<16x128xf32> -> vector<16x128xf32>
    %c0_15 = arith.constant 0 : index
    %c0_16 = arith.constant 0 : index
    %21 = vector.load %arg7[%c0_15, %c0_16] : memref<128x128xbf16, #tpu.memory_space<vmem>>, vector<128x128xbf16>
    %cst_17 = arith.constant dense<0.000000e+00> : vector<16x128xf32>
    %22 = tpu.matmul %16, %21, %cst_17 {dimension_numbers = #tpu.dot_dimension_numbers<[1], [0], [0], [1], [0, 0, 1, 1], [], []>} : vector<16x128xbf16>, vector<128x128xbf16>, vector<16x128xf32> -> vector<16x128xf32>
    %23 = arith.addf %20, %22 : vector<16x128xf32>
    %c0_18 = arith.constant 0 : index
    %c0_19 = arith.constant 0 : index
    %24 = vector.load %arg8[%c0_18, %c0_19] : memref<1x128xf32, #tpu.memory_space<vmem>>, vector<1x128xf32>
    %25 = vector.broadcast %24 : vector<1x128xf32> to vector<16x128xf32>
    %26 = arith.addf %23, %25 : vector<16x128xf32>
    %cst_20 = arith.constant 0.000000e+00 : f32
    %27 = vector.broadcast %cst_20 : f32 to vector<16x128xf32>
    %28 = arith.maximumf %26, %27 : vector<16x128xf32>
    %29 = vector.shape_cast %28 : vector<16x128xf32> to vector<1x16x128xf32>
    %30 = arith.truncf %29 : vector<1x16x128xf32> to vector<1x16x128xbf16>
    %c0_21 = arith.constant 0 : index
    %c0_22 = arith.constant 0 : index
    %c0_23 = arith.constant 0 : index
    %31 = vector.load %arg10[%c0_21, %c0_22, %c0_23] : memref<1x16x128xbf16, #tpu.memory_space<vmem>>, vector<1x16x128xbf16>
    tpu.vector_store %arg10[%c0_21, %c0_22, %c0_23], %30 {strides = array<i32>} : memref<1x16x128xbf16, #tpu.memory_space<vmem>>, vector<1x16x128xbf16>,
    %cst_24 = arith.constant dense<0.000000e+00> : vector<128xf32>
    %32 = vector.multi_reduction <add>, %28, %cst_24 [0] : vector<16x128xf32> to vector<128xf32>
    %33 = vector.shape_cast %32 : vector<128xf32> to vector<1x128xf32>
    %34 = arith.mulf %28, %28 : vector<16x128xf32>
    %cst_25 = arith.constant dense<0.000000e+00> : vector<128xf32>
    %35 = vector.multi_reduction <add>, %34, %cst_25 [0] : vector<16x128xf32> to vector<128xf32>
    %36 = vector.shape_cast %35 : vector<128xf32> to vector<1x128xf32>
    %37 = tpu.concatenate %33, %36 in 0 : vector<1x128xf32>, vector<1x128xf32> -> vector<2x128xf32>
    %c0_26 = arith.constant 0 : index
    %c0_27 = arith.constant 0 : index
    %c0_28 = arith.constant 0 : index
    %38 = vector.load %arg11[%c0_26, %c0_27, %c0_28] : memref<1x2x128xf32, #tpu.memory_space<vmem>>, vector<1x2x128xf32>
    %39 = vector.shape_cast %38 : vector<1x2x128xf32> to vector<2x128xf32>
    %40 = vector.shape_cast %37 : vector<2x128xf32> to vector<1x2x128xf32>
    tpu.vector_store %arg11[%c0_26, %c0_27, %c0_28], %40 {strides = array<i32>} : memref<1x2x128xf32, #tpu.memory_space<vmem>>, vector<1x2x128xf32>,
    %c0_29 = arith.constant 0 : index
    %c0_30 = arith.constant 0 : index
    %41 = vector.load %arg9[%c0_29, %c0_30] : memref<128x128xbf16, #tpu.memory_space<vmem>>, vector<128x128xbf16>
    %cst_31 = arith.constant dense<0.000000e+00> : vector<16x128xf32>
    %42 = tpu.matmul %16, %41, %cst_31 {dimension_numbers = #tpu.dot_dimension_numbers<[1], [0], [0], [1], [0, 0, 1, 1], [], []>} : vector<16x128xbf16>, vector<128x128xbf16>, vector<16x128xf32> -> vector<16x128xf32>
    %43 = vector.shape_cast %42 : vector<16x128xf32> to vector<1x16x128xf32>
    %c0_32 = arith.constant 0 : index
    %c0_33 = arith.constant 0 : index
    %c0_34 = arith.constant 0 : index
    %44 = vector.load %arg12[%c0_32, %c0_33, %c0_34] : memref<1x16x128xf32, #tpu.memory_space<vmem>>, vector<1x16x128xf32>
    tpu.vector_store %arg12[%c0_32, %c0_33, %c0_34], %43 {strides = array<i32>} : memref<1x16x128xf32, #tpu.memory_space<vmem>>, vector<1x16x128xf32>,
    return
  }
  func.func @transform_0(%arg0: i32) -> (i32, i32, i32) {
    %c0_i32 = arith.constant 0 : i32
    %c0_i32_0 = arith.constant 0 : i32
    %c0_i32_1 = arith.constant 0 : i32
    return %arg0, %c0_i32, %c0_i32_0 : i32, i32, i32
  }
  func.func @transform_1(%arg0: i32) -> (i32, i32, i32) {
    %c0_i32 = arith.constant 0 : i32
    %c0_i32_0 = arith.constant 0 : i32
    %c0_i32_1 = arith.constant 0 : i32
    return %arg0, %c0_i32, %c0_i32_0 : i32, i32, i32
  }
  func.func @transform_2(%arg0: i32) -> (i32, i32, i32) {
    %c0_i32 = arith.constant 0 : i32
    %c0_i32_0 = arith.constant 0 : i32
    %c0_i32_1 = arith.constant 0 : i32
    return %arg0, %c0_i32, %c0_i32_0 : i32, i32, i32
  }
  func.func @transform_3(%arg0: i32) -> (i32, i32) {
    %c0_i32 = arith.constant 0 : i32
    %c0_i32_0 = arith.constant 0 : i32
    %c0_i32_1 = arith.constant 0 : i32
    return %c0_i32, %c0_i32_0 : i32, i32
  }
  func.func @transform_4(%arg0: i32) -> (i32, i32) {
    %c0_i32 = arith.constant 0 : i32
    %c0_i32_0 = arith.constant 0 : i32
    %c0_i32_1 = arith.constant 0 : i32
    return %c0_i32, %c0_i32_0 : i32, i32
  }
  func.func @transform_5(%arg0: i32) -> (i32, i32) {
    %c0_i32 = arith.constant 0 : i32
    %c0_i32_0 = arith.constant 0 : i32
    %c0_i32_1 = arith.constant 0 : i32
    return %c0_i32, %c0_i32_0 : i32, i32
  }
  func.func @transform_6(%arg0: i32) -> (i32, i32) {
    %c0_i32 = arith.constant 0 : i32
    %c0_i32_0 = arith.constant 0 : i32
    %c0_i32_1 = arith.constant 0 : i32
    return %c0_i32, %c0_i32_0 : i32, i32
  }
  func.func @transform_7(%arg0: i32) -> (i32, i32) {
    %c0_i32 = arith.constant 0 : i32
    %c0_i32_0 = arith.constant 0 : i32
    %c0_i32_1 = arith.constant 0 : i32
    return %c0_i32, %c0_i32_0 : i32, i32
  }
  func.func @transform_8(%arg0: i32) -> (i32, i32) {
    %c0_i32 = arith.constant 0 : i32
    %c0_i32_0 = arith.constant 0 : i32
    %c0_i32_1 = arith.constant 0 : i32
    return %c0_i32, %c0_i32_0 : i32, i32
  }
  func.func @transform_9(%arg0: i32) -> (i32, i32, i32) {
    %c0_i32 = arith.constant 0 : i32
    %c0_i32_0 = arith.constant 0 : i32
    %c0_i32_1 = arith.constant 0 : i32
    return %arg0, %c0_i32, %c0_i32_0 : i32, i32, i32
  }
  func.func @transform_10(%arg0: i32) -> (i32, i32, i32) {
    %c0_i32 = arith.constant 0 : i32
    %c0_i32_0 = arith.constant 0 : i32
    %c0_i32_1 = arith.constant 0 : i32
    return %arg0, %c0_i32, %c0_i32_0 : i32, i32, i32
  }
  func.func @transform_11(%arg0: i32) -> (i32, i32, i32) {
    %c0_i32 = arith.constant 0 : i32
    %c0_i32_0 = arith.constant 0 : i32
    %c0_i32_1 = arith.constant 0 : i32
    return %arg0, %c0_i32, %c0_i32_0 : i32, i32, i32
  }
}

module attributes {stable_mosaic.version = 11 : i64} {
  func.func @kernel(%arg0: i32, %arg1: memref<1x16x128xbf16, #tpu.memory_space<vmem>>, %arg2: memref<1x16x16xbf16, #tpu.memory_space<vmem>>, %arg3: memref<1x16x1xf32, #tpu.memory_space<vmem>>, %arg4: memref<1x128xf32, #tpu.memory_space<vmem>>, %arg5: memref<1x128xf32, #tpu.memory_space<vmem>>, %arg6: memref<128x128xbf16, #tpu.memory_space<vmem>>, %arg7: memref<128x128xbf16, #tpu.memory_space<vmem>>, %arg8: memref<1x128xf32, #tpu.memory_space<vmem>>, %arg9: memref<128x128xbf16, #tpu.memory_space<vmem>>, %arg10: memref<1x16x128xf32, #tpu.memory_space<vmem>>, %arg11: memref<1x16x128xbf16, #tpu.memory_space<vmem>>, %arg12: memref<1x2x128xf32, #tpu.memory_space<vmem>>, %arg13: memref<1x16x128xf32, #tpu.memory_space<vmem>>) attributes {dimension_semantics = [#tpu.dimension_semantics<parallel>], iteration_bounds = array<i64: 2>, scalar_prefetch = 0 : i64, scratch_operands = 0 : i64, tpu.core_type = #tpu.core_type<tc>, window_params = [{transform_indices = @transform_0, window_bounds = array<i64: 1, 16, 128>}, {transform_indices = @transform_1, window_bounds = array<i64: 1, 16, 16>}, {transform_indices = @transform_2, window_bounds = array<i64: 1, 16, 1>}, {pipeline_mode = #tpu.pipeline_mode<synchronous>, transform_indices = @transform_3, window_bounds = array<i64: 1, 128>}, {pipeline_mode = #tpu.pipeline_mode<synchronous>, transform_indices = @transform_4, window_bounds = array<i64: 1, 128>}, {pipeline_mode = #tpu.pipeline_mode<synchronous>, transform_indices = @transform_5, window_bounds = array<i64: 128, 128>}, {pipeline_mode = #tpu.pipeline_mode<synchronous>, transform_indices = @transform_6, window_bounds = array<i64: 128, 128>}, {pipeline_mode = #tpu.pipeline_mode<synchronous>, transform_indices = @transform_7, window_bounds = array<i64: 1, 128>}, {pipeline_mode = #tpu.pipeline_mode<synchronous>, transform_indices = @transform_8, window_bounds = array<i64: 128, 128>}, {transform_indices = @transform_9, window_bounds = array<i64: 1, 16, 128>}, {transform_indices = @transform_10, window_bounds = array<i64: 1, 16, 128>}, {transform_indices = @transform_11, window_bounds = array<i64: 1, 2, 128>}, {transform_indices = @transform_12, window_bounds = array<i64: 1, 16, 128>}]} {
    %c0 = arith.constant 0 : index
    %c0_0 = arith.constant 0 : index
    %c0_1 = arith.constant 0 : index
    %0 = vector.load %arg1[%c0, %c0_0, %c0_1] : memref<1x16x128xbf16, #tpu.memory_space<vmem>>, vector<1x16x128xbf16>
    %1 = arith.extf %0 : vector<1x16x128xbf16> to vector<1x16x128xf32>
    %c0_2 = arith.constant 0 : index
    %c0_3 = arith.constant 0 : index
    %2 = vector.load %arg4[%c0_2, %c0_3] : memref<1x128xf32, #tpu.memory_space<vmem>>, vector<1x128xf32>
    %3 = vector.shape_cast %2 : vector<1x128xf32> to vector<1x1x128xf32>
    %4 = vector.broadcast %3 : vector<1x1x128xf32> to vector<1x16x128xf32>
    %5 = arith.mulf %1, %4 : vector<1x16x128xf32>
    %c0_4 = arith.constant 0 : index
    %c0_5 = arith.constant 0 : index
    %6 = vector.load %arg5[%c0_4, %c0_5] : memref<1x128xf32, #tpu.memory_space<vmem>>, vector<1x128xf32>
    %7 = vector.shape_cast %6 : vector<1x128xf32> to vector<1x1x128xf32>
    %8 = vector.broadcast %7 : vector<1x1x128xf32> to vector<1x16x128xf32>
    %9 = arith.addf %5, %8 : vector<1x16x128xf32>
    %10 = arith.truncf %9 : vector<1x16x128xf32> to vector<1x16x128xbf16>
    %c0_6 = arith.constant 0 : index
    %c0_7 = arith.constant 0 : index
    %c0_8 = arith.constant 0 : index
    %11 = vector.load %arg2[%c0_6, %c0_7, %c0_8] : memref<1x16x16xbf16, #tpu.memory_space<vmem>>, vector<1x16x16xbf16>
    "tpu.trace_start"() <{level = 10 : i32, message = "bij,bjc->bic"}> : () -> ()
    %cst = arith.constant dense<0.000000e+00> : vector<1x16x128xf32>
    %12 = tpu.matmul %11, %10, %cst {dimension_numbers = #tpu.dot_dimension_numbers<[2], [1], [1], [2], [0, 0, 0, 1, 1, 2], [0], [0]>} : vector<1x16x16xbf16>, vector<1x16x128xbf16>, vector<1x16x128xf32> -> vector<1x16x128xf32>
    "tpu.trace_stop"() : () -> ()
    %c0_9 = arith.constant 0 : index
    %c0_10 = arith.constant 0 : index
    %c0_11 = arith.constant 0 : index
    %13 = vector.load %arg3[%c0_9, %c0_10, %c0_11] : memref<1x16x1xf32, #tpu.memory_space<vmem>>, vector<1x16x1xf32>
    %14 = vector.broadcast %13 : vector<1x16x1xf32> to vector<1x16x128xf32>
    %15 = arith.mulf %12, %14 : vector<1x16x128xf32>
    %16 = vector.shape_cast %10 : vector<1x16x128xbf16> to vector<16x128xbf16>
    %17 = vector.shape_cast %15 : vector<1x16x128xf32> to vector<16x128xf32>
    %18 = arith.truncf %17 : vector<16x128xf32> to vector<16x128xbf16>
    %c0_12 = arith.constant 0 : index
    %c0_13 = arith.constant 0 : index
    %19 = vector.load %arg6[%c0_12, %c0_13] : memref<128x128xbf16, #tpu.memory_space<vmem>>, vector<128x128xbf16>
    %cst_14 = arith.constant dense<0.000000e+00> : vector<16x128xf32>
    %20 = tpu.matmul %18, %19, %cst_14 {dimension_numbers = #tpu.dot_dimension_numbers<[1], [0], [0], [1], [0, 0, 1, 1], [], []>} : vector<16x128xbf16>, vector<128x128xbf16>, vector<16x128xf32> -> vector<16x128xf32>
    %c0_15 = arith.constant 0 : index
    %c0_16 = arith.constant 0 : index
    %21 = vector.load %arg7[%c0_15, %c0_16] : memref<128x128xbf16, #tpu.memory_space<vmem>>, vector<128x128xbf16>
    %cst_17 = arith.constant dense<0.000000e+00> : vector<16x128xf32>
    %22 = tpu.matmul %16, %21, %cst_17 {dimension_numbers = #tpu.dot_dimension_numbers<[1], [0], [0], [1], [0, 0, 1, 1], [], []>} : vector<16x128xbf16>, vector<128x128xbf16>, vector<16x128xf32> -> vector<16x128xf32>
    %23 = arith.addf %20, %22 : vector<16x128xf32>
    %c0_18 = arith.constant 0 : index
    %c0_19 = arith.constant 0 : index
    %24 = vector.load %arg8[%c0_18, %c0_19] : memref<1x128xf32, #tpu.memory_space<vmem>>, vector<1x128xf32>
    %25 = vector.broadcast %24 : vector<1x128xf32> to vector<16x128xf32>
    %26 = arith.addf %23, %25 : vector<16x128xf32>
    %cst_20 = arith.constant 0.000000e+00 : f32
    %27 = vector.broadcast %cst_20 : f32 to vector<16x128xf32>
    %28 = arith.maximumf %26, %27 : vector<16x128xf32>
    %29 = vector.shape_cast %28 : vector<16x128xf32> to vector<1x16x128xf32>
    %30 = arith.truncf %29 : vector<1x16x128xf32> to vector<1x16x128xbf16>
    %c0_21 = arith.constant 0 : index
    %c0_22 = arith.constant 0 : index
    %c0_23 = arith.constant 0 : index
    %31 = vector.load %arg11[%c0_21, %c0_22, %c0_23] : memref<1x16x128xbf16, #tpu.memory_space<vmem>>, vector<1x16x128xbf16>
    tpu.vector_store %arg11[%c0_21, %c0_22, %c0_23], %30 {strides = array<i32>} : memref<1x16x128xbf16, #tpu.memory_space<vmem>>, vector<1x16x128xbf16>,
    %cst_24 = arith.constant dense<0.000000e+00> : vector<128xf32>
    %32 = vector.multi_reduction <add>, %28, %cst_24 [0] : vector<16x128xf32> to vector<128xf32>
    %33 = vector.shape_cast %32 : vector<128xf32> to vector<1x128xf32>
    %34 = arith.mulf %28, %28 : vector<16x128xf32>
    %cst_25 = arith.constant dense<0.000000e+00> : vector<128xf32>
    %35 = vector.multi_reduction <add>, %34, %cst_25 [0] : vector<16x128xf32> to vector<128xf32>
    %36 = vector.shape_cast %35 : vector<128xf32> to vector<1x128xf32>
    %37 = tpu.concatenate %33, %36 in 0 : vector<1x128xf32>, vector<1x128xf32> -> vector<2x128xf32>
    %c0_26 = arith.constant 0 : index
    %c0_27 = arith.constant 0 : index
    %c0_28 = arith.constant 0 : index
    %38 = vector.load %arg12[%c0_26, %c0_27, %c0_28] : memref<1x2x128xf32, #tpu.memory_space<vmem>>, vector<1x2x128xf32>
    %39 = vector.shape_cast %38 : vector<1x2x128xf32> to vector<2x128xf32>
    %40 = vector.shape_cast %37 : vector<2x128xf32> to vector<1x2x128xf32>
    tpu.vector_store %arg12[%c0_26, %c0_27, %c0_28], %40 {strides = array<i32>} : memref<1x2x128xf32, #tpu.memory_space<vmem>>, vector<1x2x128xf32>,
    %c0_29 = arith.constant 0 : index
    %c0_30 = arith.constant 0 : index
    %41 = vector.load %arg9[%c0_29, %c0_30] : memref<128x128xbf16, #tpu.memory_space<vmem>>, vector<128x128xbf16>
    %cst_31 = arith.constant dense<0.000000e+00> : vector<16x128xf32>
    %42 = tpu.matmul %16, %41, %cst_31 {dimension_numbers = #tpu.dot_dimension_numbers<[1], [0], [0], [1], [0, 0, 1, 1], [], []>} : vector<16x128xbf16>, vector<128x128xbf16>, vector<16x128xf32> -> vector<16x128xf32>
    %c0_32 = arith.constant 0 : index
    %c0_33 = arith.constant 0 : index
    %c0_34 = arith.constant 0 : index
    %43 = vector.load %arg10[%c0_32, %c0_33, %c0_34] : memref<1x16x128xf32, #tpu.memory_space<vmem>>, vector<1x16x128xf32>
    %44 = vector.shape_cast %43 : vector<1x16x128xf32> to vector<16x128xf32>
    %45 = arith.addf %42, %44 : vector<16x128xf32>
    %46 = vector.shape_cast %45 : vector<16x128xf32> to vector<1x16x128xf32>
    %c0_35 = arith.constant 0 : index
    %c0_36 = arith.constant 0 : index
    %c0_37 = arith.constant 0 : index
    %47 = vector.load %arg13[%c0_35, %c0_36, %c0_37] : memref<1x16x128xf32, #tpu.memory_space<vmem>>, vector<1x16x128xf32>
    tpu.vector_store %arg13[%c0_35, %c0_36, %c0_37], %46 {strides = array<i32>} : memref<1x16x128xf32, #tpu.memory_space<vmem>>, vector<1x16x128xf32>,
    return
  }
  func.func @transform_0(%arg0: i32) -> (i32, i32, i32) {
    %c0_i32 = arith.constant 0 : i32
    %c0_i32_0 = arith.constant 0 : i32
    %c0_i32_1 = arith.constant 0 : i32
    return %arg0, %c0_i32, %c0_i32_0 : i32, i32, i32
  }
  func.func @transform_1(%arg0: i32) -> (i32, i32, i32) {
    %c0_i32 = arith.constant 0 : i32
    %c0_i32_0 = arith.constant 0 : i32
    %c0_i32_1 = arith.constant 0 : i32
    return %arg0, %c0_i32, %c0_i32_0 : i32, i32, i32
  }
  func.func @transform_2(%arg0: i32) -> (i32, i32, i32) {
    %c0_i32 = arith.constant 0 : i32
    %c0_i32_0 = arith.constant 0 : i32
    %c0_i32_1 = arith.constant 0 : i32
    return %arg0, %c0_i32, %c0_i32_0 : i32, i32, i32
  }
  func.func @transform_3(%arg0: i32) -> (i32, i32) {
    %c0_i32 = arith.constant 0 : i32
    %c0_i32_0 = arith.constant 0 : i32
    %c0_i32_1 = arith.constant 0 : i32
    return %c0_i32, %c0_i32_0 : i32, i32
  }
  func.func @transform_4(%arg0: i32) -> (i32, i32) {
    %c0_i32 = arith.constant 0 : i32
    %c0_i32_0 = arith.constant 0 : i32
    %c0_i32_1 = arith.constant 0 : i32
    return %c0_i32, %c0_i32_0 : i32, i32
  }
  func.func @transform_5(%arg0: i32) -> (i32, i32) {
    %c0_i32 = arith.constant 0 : i32
    %c0_i32_0 = arith.constant 0 : i32
    %c0_i32_1 = arith.constant 0 : i32
    return %c0_i32, %c0_i32_0 : i32, i32
  }
  func.func @transform_6(%arg0: i32) -> (i32, i32) {
    %c0_i32 = arith.constant 0 : i32
    %c0_i32_0 = arith.constant 0 : i32
    %c0_i32_1 = arith.constant 0 : i32
    return %c0_i32, %c0_i32_0 : i32, i32
  }
  func.func @transform_7(%arg0: i32) -> (i32, i32) {
    %c0_i32 = arith.constant 0 : i32
    %c0_i32_0 = arith.constant 0 : i32
    %c0_i32_1 = arith.constant 0 : i32
    return %c0_i32, %c0_i32_0 : i32, i32
  }
  func.func @transform_8(%arg0: i32) -> (i32, i32) {
    %c0_i32 = arith.constant 0 : i32
    %c0_i32_0 = arith.constant 0 : i32
    %c0_i32_1 = arith.constant 0 : i32
    return %c0_i32, %c0_i32_0 : i32, i32
  }
  func.func @transform_9(%arg0: i32) -> (i32, i32, i32) {
    %c0_i32 = arith.constant 0 : i32
    %c0_i32_0 = arith.constant 0 : i32
    %c0_i32_1 = arith.constant 0 : i32
    return %arg0, %c0_i32, %c0_i32_0 : i32, i32, i32
  }
  func.func @transform_10(%arg0: i32) -> (i32, i32, i32) {
    %c0_i32 = arith.constant 0 : i32
    %c0_i32_0 = arith.constant 0 : i32
    %c0_i32_1 = arith.constant 0 : i32
    return %arg0, %c0_i32, %c0_i32_0 : i32, i32, i32
  }
  func.func @transform_11(%arg0: i32) -> (i32, i32, i32) {
    %c0_i32 = arith.constant 0 : i32
    %c0_i32_0 = arith.constant 0 : i32
    %c0_i32_1 = arith.constant 0 : i32
    return %arg0, %c0_i32, %c0_i32_0 : i32, i32, i32
  }
  func.func @transform_12(%arg0: i32) -> (i32, i32, i32) {
    %c0_i32 = arith.constant 0 : i32
    %c0_i32_0 = arith.constant 0 : i32
    %c0_i32_1 = arith.constant 0 : i32
    return %arg0, %c0_i32, %c0_i32_0 : i32, i32, i32
  }
}

module attributes {stable_mosaic.version = 11 : i64} {
  func.func @_final_kernel(%arg0: i32, %arg1: memref<1x16x128xbf16, #tpu.memory_space<vmem>>, %arg2: memref<1x16x128xf32, #tpu.memory_space<vmem>>, %arg3: memref<1x128xf32, #tpu.memory_space<vmem>>, %arg4: memref<1x128xf32, #tpu.memory_space<vmem>>, %arg5: memref<128x128xbf16, #tpu.memory_space<vmem>>, %arg6: memref<1x128xf32, #tpu.memory_space<vmem>>, %arg7: memref<1x16x128xf32, #tpu.memory_space<vmem>>) attributes {dimension_semantics = [#tpu.dimension_semantics<parallel>], iteration_bounds = array<i64: 2>, scalar_prefetch = 0 : i64, scratch_operands = 0 : i64, tpu.core_type = #tpu.core_type<tc>, window_params = [{transform_indices = @transform_0, window_bounds = array<i64: 1, 16, 128>}, {transform_indices = @transform_1, window_bounds = array<i64: 1, 16, 128>}, {pipeline_mode = #tpu.pipeline_mode<synchronous>, transform_indices = @transform_2, window_bounds = array<i64: 1, 128>}, {pipeline_mode = #tpu.pipeline_mode<synchronous>, transform_indices = @transform_3, window_bounds = array<i64: 1, 128>}, {pipeline_mode = #tpu.pipeline_mode<synchronous>, transform_indices = @transform_4, window_bounds = array<i64: 128, 128>}, {pipeline_mode = #tpu.pipeline_mode<synchronous>, transform_indices = @transform_5, window_bounds = array<i64: 1, 128>}, {transform_indices = @transform_6, window_bounds = array<i64: 1, 16, 128>}]} {
    %c0 = arith.constant 0 : index
    %c0_0 = arith.constant 0 : index
    %c0_1 = arith.constant 0 : index
    %0 = vector.load %arg1[%c0, %c0_0, %c0_1] : memref<1x16x128xbf16, #tpu.memory_space<vmem>>, vector<1x16x128xbf16>
    %1 = arith.extf %0 : vector<1x16x128xbf16> to vector<1x16x128xf32>
    %c0_2 = arith.constant 0 : index
    %c0_3 = arith.constant 0 : index
    %2 = vector.load %arg3[%c0_2, %c0_3] : memref<1x128xf32, #tpu.memory_space<vmem>>, vector<1x128xf32>
    %3 = vector.shape_cast %2 : vector<1x128xf32> to vector<1x1x128xf32>
    %4 = vector.broadcast %3 : vector<1x1x128xf32> to vector<1x16x128xf32>
    %5 = arith.mulf %1, %4 : vector<1x16x128xf32>
    %c0_4 = arith.constant 0 : index
    %c0_5 = arith.constant 0 : index
    %6 = vector.load %arg4[%c0_4, %c0_5] : memref<1x128xf32, #tpu.memory_space<vmem>>, vector<1x128xf32>
    %7 = vector.shape_cast %6 : vector<1x128xf32> to vector<1x1x128xf32>
    %8 = vector.broadcast %7 : vector<1x1x128xf32> to vector<1x16x128xf32>
    %9 = arith.addf %5, %8 : vector<1x16x128xf32>
    %10 = vector.shape_cast %9 : vector<1x16x128xf32> to vector<16x128xf32>
    %11 = arith.truncf %10 : vector<16x128xf32> to vector<16x128xbf16>
    %c0_6 = arith.constant 0 : index
    %c0_7 = arith.constant 0 : index
    %c0_8 = arith.constant 0 : index
    %12 = vector.load %arg2[%c0_6, %c0_7, %c0_8] : memref<1x16x128xf32, #tpu.memory_space<vmem>>, vector<1x16x128xf32>
    %13 = vector.shape_cast %12 : vector<1x16x128xf32> to vector<16x128xf32>
    %c0_9 = arith.constant 0 : index
    %c0_10 = arith.constant 0 : index
    %14 = vector.load %arg5[%c0_9, %c0_10] : memref<128x128xbf16, #tpu.memory_space<vmem>>, vector<128x128xbf16>
    %cst = arith.constant dense<0.000000e+00> : vector<16x128xf32>
    %15 = tpu.matmul %11, %14, %cst {dimension_numbers = #tpu.dot_dimension_numbers<[1], [0], [0], [1], [0, 0, 1, 1], [], []>} : vector<16x128xbf16>, vector<128x128xbf16>, vector<16x128xf32> -> vector<16x128xf32>
    %16 = arith.addf %13, %15 : vector<16x128xf32>
    %c0_11 = arith.constant 0 : index
    %c0_12 = arith.constant 0 : index
    %17 = vector.load %arg6[%c0_11, %c0_12] : memref<1x128xf32, #tpu.memory_space<vmem>>, vector<1x128xf32>
    %18 = vector.broadcast %17 : vector<1x128xf32> to vector<16x128xf32>
    %19 = arith.addf %16, %18 : vector<16x128xf32>
    %cst_13 = arith.constant 0.000000e+00 : f32
    %20 = vector.broadcast %cst_13 : f32 to vector<16x128xf32>
    %21 = arith.maximumf %19, %20 : vector<16x128xf32>
    %22 = vector.shape_cast %21 : vector<16x128xf32> to vector<1x16x128xf32>
    %c0_14 = arith.constant 0 : index
    %c0_15 = arith.constant 0 : index
    %c0_16 = arith.constant 0 : index
    %23 = vector.load %arg7[%c0_14, %c0_15, %c0_16] : memref<1x16x128xf32, #tpu.memory_space<vmem>>, vector<1x16x128xf32>
    tpu.vector_store %arg7[%c0_14, %c0_15, %c0_16], %22 {strides = array<i32>} : memref<1x16x128xf32, #tpu.memory_space<vmem>>, vector<1x16x128xf32>,
    return
  }
  func.func @transform_0(%arg0: i32) -> (i32, i32, i32) {
    %c0_i32 = arith.constant 0 : i32
    %c0_i32_0 = arith.constant 0 : i32
    %c0_i32_1 = arith.constant 0 : i32
    return %arg0, %c0_i32, %c0_i32_0 : i32, i32, i32
  }
  func.func @transform_1(%arg0: i32) -> (i32, i32, i32) {
    %c0_i32 = arith.constant 0 : i32
    %c0_i32_0 = arith.constant 0 : i32
    %c0_i32_1 = arith.constant 0 : i32
    return %arg0, %c0_i32, %c0_i32_0 : i32, i32, i32
  }
  func.func @transform_2(%arg0: i32) -> (i32, i32) {
    %c0_i32 = arith.constant 0 : i32
    %c0_i32_0 = arith.constant 0 : i32
    %c0_i32_1 = arith.constant 0 : i32
    return %c0_i32, %c0_i32_0 : i32, i32
  }
  func.func @transform_3(%arg0: i32) -> (i32, i32) {
    %c0_i32 = arith.constant 0 : i32
    %c0_i32_0 = arith.constant 0 : i32
    %c0_i32_1 = arith.constant 0 : i32
    return %c0_i32, %c0_i32_0 : i32, i32
  }
  func.func @transform_4(%arg0: i32) -> (i32, i32) {
    %c0_i32 = arith.constant 0 : i32
    %c0_i32_0 = arith.constant 0 : i32
    %c0_i32_1 = arith.constant 0 : i32
    return %c0_i32, %c0_i32_0 : i32, i32
  }
  func.func @transform_5(%arg0: i32) -> (i32, i32) {
    %c0_i32 = arith.constant 0 : i32
    %c0_i32_0 = arith.constant 0 : i32
    %c0_i32_1 = arith.constant 0 : i32
    return %c0_i32, %c0_i32_0 : i32, i32
  }
  func.func @transform_6(%arg0: i32) -> (i32, i32, i32) {
    %c0_i32 = arith.constant 0 : i32
    %c0_i32_0 = arith.constant 0 : i32
    %c0_i32_1 = arith.constant 0 : i32
    return %arg0, %c0_i32, %c0_i32_0 : i32, i32, i32
  }
}

</mosaic_0001>

<bundles_post_ra>
// kernel: gnn_forward.4
= control target key start
LH: loop header
LB: loop body
LE: loop exit
PB: predicated region body
PF: predicated region fallthrough
CT: control target
= control target key end

     0   :  { %s1039_s30 = smov 0   ;;  %s1154_s0 = inlined_call_operand.vmem [shape: f32[2,16,128], index: 0, kind: input, shape index: {}]   ;;  %s1155_s1 = inlined_call_operand.vmem [shape: bf16[2,16,16], index: 1, kind: input, shape index: {}]   ;;  %s1156_s2 = inlined_call_operand.vmem [shape: f32[2,16,1], index: 2, kind: input, shape index: {}]   ;;  %s1157_s3 = inlined_call_operand.vmem [shape: f32[1,128], index: 3, kind: input, shape index: {}]   ;;  %s1158_s4 = inlined_call_operand.vmem [shape: f32[1,128], index: 4, kind: input, shape index: {}]   ;;  %s1159_s5 = inlined_call_operand.vmem [shape: bf16[128,128], index: 5, kind: input, shape index: {}]   ;;  %s1160_s6 = inlined_call_operand.vmem [shape: bf16[128,128], index: 6, kind: input, shape index: {}]   ;;  %s1161_s7 = inlined_call_operand.vmem [shape: f32[1,128], index: 7, kind: input, shape index: {}]   ;;  %s1162_s8 = inlined_call_operand.vmem [shape: bf16[2,16,128], index: 8, kind: output, shape index: {0}]   ;;  %s1163_s9 = inlined_call_operand.vmem [shape: f32[2,2,128], index: 9, kind: output, shape index: {1}]  }
   0x1 LB: > { %s833_s10 = sadd.s32 4294967295, %s984_s30   ;;  %p837_p0 = scmp.ge.s32.totalorder %s984_s30, 1  ;;  %s984_s30 = sphi %s1039_s30, %s20_s30  }
   0x2   : > { %p310_p1 = scmp.lt.s32.totalorder %s984_s30, 3 }
   0x4   : > { %p311_p2 = pnand %p837_p0, %p310_p1 }
   0x5   : > { %p360_p3 = scmp.lt.s32.totalorder (!%p311_p2), %s833_s10, 1  ;;  %v986_v0 = vmov (!%p311_p2), 0.0   ;;  %v962_v1 = vld [vmem:[%s1160_s6] sm:$0xff] (!%p311_p2)   ;;  %vm987_vm0 = vmmov (!%p311_p2), 0   ;;  %v988_v2 = vmov (!%p311_p2), 0   ;;  %v964_v4 = vld [vmem:[%s1160_s6 + $0x8] sm:$0xff] (!%p311_p2)  }
   0x6   : > { %314 = sbr.rel (%p311_p2) target bundleno = 482 (0x1e2), region = 52  ;;  %903 = vmatprep.subr.bf16.mxu0 (!%p311_p2), %v986_v0  ;;  %909 = vmatprep.subr.bf16.mxu1 (!%p311_p2), %v986_v0  ;;  %v847_v3 = vld [vmem:[%s1157_s3] ss:$0 sm:$0xff] (!%p311_p2)  ;;  %v966_v11 = vld [vmem:[%s1160_s6 + $0x10] sm:$0xff] (!%p311_p2)   ;;  %v968_v16 = vld [vmem:[%s1160_s6 + $0x18] sm:$0xff] (!%p311_p2)   ;;  %vm413_vm1 = vcmask (!%p311_p2), 130048  }
   0x7   : > { %905 = vmatprep.mubr.msk.bf16.mxu0 (!%p311_p2), %vm987_vm0, %v986_v0  ;;  %960 = vset.pattern.permute.xlu0 (!%p311_p2), %v988_v2  ;;  %v848_v7 = vld [vmem:[%s1158_s4] ss:$0 sm:$0xff] (!%p311_p2)  ;;  %v965_v20 = vld [vmem:[%s1159_s5 + $0x8] sm:$0xff] (!%p311_p2)   ;;  %v967_v22 = vld [vmem:[%s1159_s5 + $0x10] sm:$0xff] (!%p311_p2)   ;;  %vm720_vm2 = vcmask (!%p311_p2), 1040384  }
   0x8   : > { %910 = vmatpush3.bf16.msra.mxu1 (!%p311_p2), %v962_v1  ;;  %925 = vmatprep.mubr.msk.bf16.mxu1 (!%p311_p2), %vm987_vm0, %v986_v0  ;;  %v963_v18 = vld [vmem:[%s1159_s5] sm:$0xff] (!%p311_p2)   ;;  %v972_v21 = vld [vmem:[%s1160_s6 + $0x28] sm:$0xff] (!%p311_p2)   ;;  %v974_v23 = vld [vmem:[%s1160_s6 + $0x30] sm:$0xff] (!%p311_p2)  }
   0x9   : > { %911 = vmatprep.subr.bf16.mxu1 (!%p311_p2), %v986_v0  ;;  %v970_v19 = vld [vmem:[%s1160_s6 + $0x20] sm:$0xff] (!%p311_p2)   ;;  %v969_v24 = vld [vmem:[%s1159_s5 + $0x18] sm:$0xff] (!%p311_p2)   ;;  %v973_v26 = vld [vmem:[%s1159_s5 + $0x28] sm:$0xff] (!%p311_p2)  }
   0xa   : > { %v971_v25 = vld [vmem:[%s1159_s5 + $0x20] sm:$0xff] (!%p311_p2)   ;;  %v975_v27 = vld [vmem:[%s1159_s5 + $0x30] sm:$0xff] (!%p311_p2)   ;;  %v976_v28 = vld [vmem:[%s1160_s6 + $0x38] sm:$0xff] (!%p311_p2)  }
   0xb   : > { %v977_v29 = vld [vmem:[%s1159_s5 + $0x38] sm:$0xff] (!%p311_p2)   ;;  %v867_v44 = vld [vmem:[%s1161_s7] ss:$0 sm:$0xff] (!%p311_p2) }
   0xc   : > { %912 = vmatpush3.bf16.msra.mxu1 (!%p311_p2), %v964_v4 }
   0xd   : > { %s1165_s10 = smov (!%p360_p3, %s833_s10), 1  ;;  %913 = vmatprep.subr.bf16.mxu1 %v986_v0 }
   0xe   : > { %s872_s13 = sshll.u32 %s1165_s10, 4  ;;  %s873_s23 = sshll.u32 %s1165_s10, 3 }
   0xf   : > { %s364_s20 = scalar_lea.vmem %s1154_s0, %s872_s13  ;;  %s374_s26 = scalar_lea.vmem %s1156_s2, %s872_s13 }
  0x10   : > { %v385_v5 = vld [vmem:[%s364_s20] sm:$0xff]  ;;  %v386_v6 = vld [vmem:[%s364_s20 + $0x8] sm:$0xff]  ;;  %s369_s29 = scalar_lea.vmem %s1155_s1, %s873_s23  ;;  %914 = vmatpush3.bf16.msra.mxu1 %v966_v11  ;;  %s846_s27 = sshll.u32 %s1165_s10, 1 }
  0x11   : > { %v394_v8 = vmul.f32 %v847_v3, %v385_v5  ;;  %v395_v9 = vmul.f32 %v847_v3, %v386_v6  ;;  %v458_v10 = vld [vmem:[%s374_s26] sm:$0xff]  ;;  %v459_v14 = vld [vmem:[%s374_s26 + $0x8] sm:$0xff]  ;;  %915 = vmatprep.subr.bf16.mxu1 %v986_v0  ;;  %s379_s26 = scalar_lea.vmem %s1162_s8, %s873_s23 }
  0x12   : > { %462 = vperm.xlu0 %960, %v458_v10   ;;  %v961_v17 = vld [vmem:[%s369_s29] sm:$0xff]   ;;  %s383_s29 = scalar_lea.vmem %s1163_s9, %s846_s27 }
  0x13   : > { %v403_v12 = vadd.f32 %v848_v7, %v394_v8  ;;  %v404_v13 = vadd.f32 %v848_v7, %v395_v9 }
  0x14   : > { %916 = vmatpush3.bf16.msra.mxu1 %v968_v16 }
  0x15   : > { %v405_v15 = vpack.c.bf16 %v404_v13, %v403_v12  ;;  %917 = vmatprep.subr.bf16.mxu1 %v986_v0 }
  0x16   : > { %467 = vperm.xlu0 %960, %v459_v14  }
  0x17   : > { %904 = vmatpush3.bf16.msra.mxu0 %v405_v15 }
  0x18   : > { %929 = vmatprep.subr.bf16.mxu0 %v986_v0  ;;  %918 = vmatpush3.bf16.msra.mxu1 %v970_v19 }
  0x19   : > { %919 = vmatprep.subr.bf16.mxu1 %v986_v0 }
  0x1a   : > { %906 = vmatmul.mubr.msk.bf16.vlgmr.msra.gmra.mrb[0].mxu0 %vm413_vm1, %v961_v17 }
  0x1b   : > { %930 = vmatpush3.bf16.msra.mxu0 %v963_v18  ;;  %945 = vmatprep.mubr.msk.bf16.mxu0 %vm987_vm0, %v986_v0 }
  0x1c   : > { %931 = vmatprep.subr.bf16.mxu0 %v986_v0  ;;  %920 = vmatpush3.bf16.msra.mxu1 %v972_v21 }
  0x1d   : > { %921 = vmatprep.subr.bf16.mxu1 %v986_v0 }
  0x1f   : > { %932 = vmatpush3.bf16.msra.mxu0 %v965_v20 }
  0x20   : > { %933 = vmatprep.subr.bf16.mxu0 %v986_v0  ;;  %922 = vmatpush3.bf16.msra.mxu1 %v974_v23 }
  0x21   : > { %923 = vmatprep.subr.bf16.mxu1 %v986_v0 }
  0x23   : > { %934 = vmatpush3.bf16.msra.mxu0 %v967_v22 }
  0x24   : > { %935 = vmatprep.subr.bf16.mxu0 %v986_v0  ;;  %924 = vmatpush3.bf16.msra.mxu1 %v976_v28 }
  0x27   : > { %936 = vmatpush3.bf16.msra.mxu0 %v969_v24  ;;  %926 = vmatmul.mubr.bf16.vlgmr.msra.gmra.mrb[0].mxu1 %v405_v15 }
  0x28   : > { %937 = vmatprep.subr.bf16.mxu0 %v986_v0 }
  0x2b   : > { %938 = vmatpush3.bf16.msra.mxu0 %v971_v25 }
  0x2c   : > { %939 = vmatprep.subr.bf16.mxu0 %v986_v0 }
  0x2f   : > { %940 = vmatpush3.bf16.msra.mxu0 %v973_v26 }
  0x30   : > { %941 = vmatprep.subr.bf16.mxu0 %v986_v0 }
  0x33   : > { %942 = vmatpush3.bf16.msra.mxu0 %v975_v27 }
  0x34   : > { %943 = vmatprep.subr.bf16.mxu0 %v986_v0 }
  0x37   : > { %944 = vmatpush3.bf16.msra.mxu0 %v977_v29 }
  0x91   : > { %v463_v30 = vpop.permute.xlu0 %462 }
  0x95   : > { %v468_v33 = vpop.permute.xlu0 %467 }
  0xed   : > { %v451_v31 = vpop.f32.mrb[0].mxu0 }
  0xee   : > { %v907_v32 = vpop.f32.mrb[1].mxu0  ;;  %v470_v35 = vmul.f32 %v463_v30, %v451_v31 }
  0xef   : > { %v454_v34 = vpop.f32.mrb[2].mxu0 }
  0xf0   : > { %v471_v36 = vmul.f32 %v468_v33, %v454_v34  ;;  %v908_v37 = vpop.f32.mrb[3].mxu0 }
  0xf2   : > { %v472_v38 = vpack.c.bf16 %v471_v36, %v470_v35 }
  0xf4   : > { %946 = vmatmul.mubr.bf16.vlgmr.msra.gmra.mrb[4].mxu0 %v472_v38 }
  0xfa   : > { %v587_v39 = vpop.f32.mrb[0].mxu1 }
  0xfb   : > { %v927_v40 = vpop.f32.mrb[1].mxu1 }
  0xfc   : > { %v590_v41 = vpop.f32.mrb[2].mxu1 }
  0xfd   : > { %v928_v42 = vpop.f32.mrb[3].mxu1 }
 0x1c7   : > { %v676_v43 = vpop.f32.mrb[4].mxu0 }
 0x1c8   : > { %v677_v45 = vadd.f32 %v676_v43, %v587_v39  ;;  %v947_v46 = vpop.f32.mrb[5].mxu0 }
 0x1c9   : > { %v679_v47 = vpop.f32.mrb[6].mxu0 }
 0x1ca   : > { %v690_v48 = vadd.f32 %v867_v44, %v677_v45  ;;  %v680_v49 = vadd.f32 %v679_v47, %v590_v41  ;;  %v948_v50 = vpop.f32.mrb[7].mxu0 }
 0x1cc   : > { %v692_v51 = vmax.f32 %v690_v48, 0.0  ;;  %v691_v52 = vadd.f32 %v867_v44, %v680_v49 }
 0x1ce   : > { %v693_v53 = vmax.f32 %v691_v52, 0.0  ;;  %v711_v54 = vmul.f32 %v692_v51, %v692_v51 }
 0x1d0   : > { %v881_v55 = vpack.c.bf16 %v693_v53, %v692_v51  ;;  %v704_v56 = vadd.f32 %v693_v53, %v692_v51  ;;  %v712_v57 = vmul.f32 %v693_v53, %v693_v53 }
 0x1d2   : > { %882 = vst [vmem:[%s379_s26] sm:$0xff] %v881_v55   ;;  %v705_v58 = vrot.slane %v704_v56, 4  ;;  %v713_v59 = vadd.f32 %v712_v57, %v711_v54 }
 0x1d4   : > { %v706_v60 = vadd.f32 %v705_v58, %v704_v56  ;;  %v714_v61 = vrot.slane %v713_v59, 4 }
 0x1d6   : > { %v707_v62 = vrot.slane %v706_v60, 2  ;;  %v715_v63 = vadd.f32 %v714_v61, %v713_v59 }
 0x1d8   : > { %v708_v0 = vadd.f32 %v707_v62, %v706_v60  ;;  %v716_v1 = vrot.slane %v715_v63, 2 }
 0x1da   : > { %v709_v2 = vrot.slane %v708_v0, 1  ;;  %v717_v3 = vadd.f32 %v716_v1, %v715_v63 }
 0x1dc   : > { %v718_v4 = vrot.slane %v717_v3, 1  ;;  %v710_v5 = vadd.f32 %v709_v2, %v708_v0 }
 0x1de   : > { %v719_v6 = vadd.f32 %v718_v4, %v717_v3 }
 0x1e0   : > { %v721_v7 = vsel %vm720_vm2, %v710_v5, %v719_v6 }
 0x1e1   : > { %722 = vst [vmem:[%s383_s29] sm:$0x3] %v721_v7 }
 0x1e2 PF: > { %s20_s30 = sadd.s32 1, %s984_s30  }
 0x1e3   : > { %p17_p4 = scmp.ge.s32.totalorder %s20_s30, 4  }
 0x1e5   :  { %19 = sbr.rel (!%p17_p4) target bundleno = 1 (0x1), region = 100 }

// kernel: gnn_forward.5
= control target key start
LH: loop header
LB: loop body
LE: loop exit
PB: predicated region body
PF: predicated region fallthrough
CT: control target
= control target key end

     0   :  { %s1309_s17 = smov 0   ;;  %s1471_s0 = inlined_call_operand.vmem [shape: bf16[2,16,128], index: 0, kind: input, shape index: {}]   ;;  %s1472_s1 = inlined_call_operand.vmem [shape: bf16[2,16,16], index: 1, kind: input, shape index: {}]   ;;  %s1473_s2 = inlined_call_operand.vmem [shape: f32[2,16,1], index: 2, kind: input, shape index: {}]   ;;  %s1474_s3 = inlined_call_operand.vmem [shape: f32[1,128], index: 3, kind: input, shape index: {}]   ;;  %s1475_s4 = inlined_call_operand.vmem [shape: f32[1,128], index: 4, kind: input, shape index: {}]   ;;  %s1476_s5 = inlined_call_operand.vmem [shape: bf16[128,128], index: 5, kind: input, shape index: {}]   ;;  %s1477_s6 = inlined_call_operand.vmem [shape: bf16[128,128], index: 6, kind: input, shape index: {}]   ;;  %s1478_s7 = inlined_call_operand.vmem [shape: f32[1,128], index: 7, kind: input, shape index: {}]   ;;  %s1479_s8 = inlined_call_operand.vmem [shape: bf16[128,128], index: 8, kind: input, shape index: {}]   ;;  %s1480_s9 = inlined_call_operand.vmem [shape: bf16[2,16,128], index: 9, kind: output, shape index: {0}]   ;;  %s1481_s10 = inlined_call_operand.vmem [shape: f32[2,2,128], index: 10, kind: output, shape index: {1}]   ;;  %s1482_s11 = inlined_call_operand.vmem [shape: f32[2,16,128], index: 11, kind: output, shape index: {2}]  }
   0x1 LB: > { %s1041_s18 = sadd.s32 4294967295, %s1244_s17   ;;  %p1045_p0 = scmp.ge.s32.totalorder %s1244_s17, 1  ;;  %s1244_s17 = sphi %s1309_s17, %s22_s17  }
   0x2   : > { %p362_p1 = scmp.lt.s32.totalorder %s1244_s17, 3 }
   0x4   : > { %p363_p2 = pnand %p1045_p0, %p362_p1 }
   0x5   : > { %p421_p3 = scmp.lt.s32.totalorder (!%p363_p2), %s1041_s18, 1  ;;  %v1246_v0 = vmov (!%p363_p2), 0.0   ;;  %v1214_v1 = vld [vmem:[%s1477_s6] sm:$0xff] (!%p363_p2)   ;;  %vm1247_vm0 = vmmov (!%p363_p2), 0   ;;  %v1248_v2 = vmov (!%p363_p2), 0   ;;  %v1215_v3 = vld [vmem:[%s1477_s6 + $0x8] sm:$0xff] (!%p363_p2)  }
   0x6   : > { %366 = sbr.rel (%p363_p2) target bundleno = 484 (0x1e4), region = 56  ;;  %1135 = vmatprep.subr.bf16.mxu0 (!%p363_p2), %v1246_v0  ;;  %1141 = vmatprep.subr.bf16.mxu1 (!%p363_p2), %v1246_v0  ;;  %v1057_v4 = vld [vmem:[%s1474_s3] ss:$0 sm:$0xff] (!%p363_p2)  ;;  %v1216_v9 = vld [vmem:[%s1477_s6 + $0x10] sm:$0xff] (!%p363_p2)   ;;  %v1217_v16 = vld [vmem:[%s1477_s6 + $0x18] sm:$0xff] (!%p363_p2)   ;;  %vm481_vm1 = vcmask (!%p363_p2), 130048  }
   0x7   : > { %1137 = vmatprep.mubr.msk.bf16.mxu0 (!%p363_p2), %vm1247_vm0, %v1246_v0  ;;  %1212 = vset.pattern.permute.xlu0 (!%p363_p2), %v1248_v2  ;;  %v1058_v10 = vld [vmem:[%s1475_s4] ss:$0 sm:$0xff] (!%p363_p2)  ;;  %v1220_v21 = vld [vmem:[%s1476_s5 + $0x8] sm:$0xff] (!%p363_p2)   ;;  %v1222_v23 = vld [vmem:[%s1476_s5 + $0x10] sm:$0xff] (!%p363_p2)   ;;  %vm788_vm2 = vcmask (!%p363_p2), 1040384  }
   0x8   : > { %1142 = vmatpush3.bf16.msra.mxu1 (!%p363_p2), %v1214_v1  ;;  %1157 = vmatprep.mubr.msk.bf16.mxu1 (!%p363_p2), %vm1247_vm0, %v1246_v0  ;;  %v1218_v19 = vld [vmem:[%s1476_s5] sm:$0xff] (!%p363_p2)   ;;  %v1221_v22 = vld [vmem:[%s1477_s6 + $0x28] sm:$0xff] (!%p363_p2)   ;;  %v1223_v24 = vld [vmem:[%s1477_s6 + $0x30] sm:$0xff] (!%p363_p2)  }
   0x9   : > { %1143 = vmatprep.subr.bf16.mxu1 (!%p363_p2), %v1246_v0  ;;  %v1219_v20 = vld [vmem:[%s1477_s6 + $0x20] sm:$0xff] (!%p363_p2)   ;;  %v1224_v25 = vld [vmem:[%s1476_s5 + $0x18] sm:$0xff] (!%p363_p2)   ;;  %v1227_v29 = vld [vmem:[%s1476_s5 + $0x28] sm:$0xff] (!%p363_p2)  }
   0xa   : > { %v1225_v26 = vld [vmem:[%s1477_s6 + $0x38] sm:$0xff] (!%p363_p2)   ;;  %v1226_v27 = vld [vmem:[%s1476_s5 + $0x20] sm:$0xff] (!%p363_p2)   ;;  %v1229_v30 = vld [vmem:[%s1476_s5 + $0x30] sm:$0xff] (!%p363_p2)  }
   0xb   : > { %v1228_v28 = vld [vmem:[%s1479_s8] sm:$0xff] (!%p363_p2)   ;;  %v1230_v31 = vld [vmem:[%s1479_s8 + $0x8] sm:$0xff] (!%p363_p2)   ;;  %v1231_v32 = vld [vmem:[%s1476_s5 + $0x38] sm:$0xff] (!%p363_p2)  }
   0xc   : > { %1144 = vmatpush3.bf16.msra.mxu1 (!%p363_p2), %v1215_v3  ;;  %v1232_v33 = vld [vmem:[%s1479_s8 + $0x10] sm:$0xff] (!%p363_p2)   ;;  %v1233_v34 = vld [vmem:[%s1479_s8 + $0x18] sm:$0xff] (!%p363_p2)   ;;  %v1234_v35 = vld [vmem:[%s1479_s8 + $0x20] sm:$0xff] (!%p363_p2)  }
   0xd   : > { %s1484_s18 = smov (!%p421_p3, %s1041_s18), 1  ;;  %1145 = vmatprep.subr.bf16.mxu1 %v1246_v0  ;;  %v1235_v36 = vld [vmem:[%s1479_s8 + $0x28] sm:$0xff]   ;;  %v1236_v37 = vld [vmem:[%s1479_s8 + $0x30] sm:$0xff]   ;;  %v1237_v38 = vld [vmem:[%s1479_s8 + $0x38] sm:$0xff]  }
   0xe   : > { %s1332_s23 = sshll.u32 %s1484_s18, 3  ;;  %s1092_s26 = sshll.u32 %s1484_s18, 4  ;;  %v1077_v57 = vld [vmem:[%s1478_s7] ss:$0 sm:$0xff] }
   0xf   : > { %s425_s29 = scalar_lea.vmem %s1471_s0, %s1332_s23  ;;  %s430_s13 = scalar_lea.vmem %s1472_s1, %s1332_s23 }
  0x10   : > { %v1098_v5 = vld [vmem:[%s425_s29] sm:$0xff]   ;;  %s435_s16 = scalar_lea.vmem %s1473_s2, %s1092_s26  ;;  %1146 = vmatpush3.bf16.msra.mxu1 %v1216_v9  ;;  %s449_s22 = scalar_lea.vmem %s1482_s11, %s1092_s26 }
  0x11   : > { %v1099_v6 = vunpack.c.l.bf16 %v1098_v5  ;;  %v1100_v7 = vunpack.c.h.bf16 %v1098_v5  ;;  %v526_v8 = vld [vmem:[%s435_s16] sm:$0xff]  ;;  %v527_v13 = vld [vmem:[%s435_s16 + $0x8] sm:$0xff]  ;;  %1147 = vmatprep.subr.bf16.mxu1 %v1246_v0  ;;  %s440_s26 = scalar_lea.vmem %s1480_s9, %s1332_s23  ;;  %s1054_s29 = sshll.u32 %s1484_s18, 1 }
  0x12   : > { %530 = vperm.xlu0 %1212, %v526_v8   ;;  %v1213_v18 = vld [vmem:[%s430_s13] sm:$0xff]   ;;  %s444_s12 = scalar_lea.vmem %s1481_s10, %s1054_s29 }
  0x13   : > { %v462_v11 = vmul.f32 %v1099_v6, %v1057_v4  ;;  %v463_v12 = vmul.f32 %v1100_v7, %v1057_v4 }
  0x14   : > { %1148 = vmatpush3.bf16.msra.mxu1 %v1217_v16 }
  0x15   : > { %v471_v14 = vadd.f32 %v1058_v10, %v462_v11  ;;  %v472_v15 = vadd.f32 %v1058_v10, %v463_v12  ;;  %1149 = vmatprep.subr.bf16.mxu1 %v1246_v0 }
  0x16   : > { %535 = vperm.xlu0 %1212, %v527_v13  }
  0x17   : > { %v1363_v17 = vpack.c.bf16 %v472_v15, %v471_v14 }
  0x18   : > { %1150 = vmatpush3.bf16.msra.mxu1 %v1219_v20 }
  0x19   : > { %1136 = vmatpush3.bf16.msra.mxu0 %v1363_v17  ;;  %1151 = vmatprep.subr.bf16.mxu1 %v1246_v0 }
  0x1a   : > { %1161 = vmatprep.subr.bf16.mxu0 %v1246_v0 }
  0x1c   : > { %1138 = vmatmul.mubr.msk.bf16.vlgmr.msra.gmra.mrb[0].mxu0 %vm481_vm1, %v1213_v18  ;;  %1152 = vmatpush3.bf16.msra.mxu1 %v1221_v22 }
  0x1d   : > { %1162 = vmatpush3.bf16.msra.mxu0 %v1218_v19  ;;  %1177 = vmatprep.mubr.msk.bf16.mxu0 %vm1247_vm0, %v1246_v0 }
  0x1e   : > { %1163 = vmatprep.subr.bf16.mxu0 %v1246_v0  ;;  %1153 = vmatprep.subr.bf16.mxu1 %v1246_v0 }
  0x20   : > { %1154 = vmatpush3.bf16.msra.mxu1 %v1223_v24 }
  0x21   : > { %1164 = vmatpush3.bf16.msra.mxu0 %v1220_v21  ;;  %1155 = vmatprep.subr.bf16.mxu1 %v1246_v0 }
  0x22   : > { %1165 = vmatprep.subr.bf16.mxu0 %v1246_v0 }
  0x24   : > { %1156 = vmatpush3.bf16.msra.mxu1 %v1225_v26 }
  0x25   : > { %1166 = vmatpush3.bf16.msra.mxu0 %v1222_v23  ;;  %1181 = vmatprep.subr.bf16.mxu1 %v1246_v0 }
  0x26   : > { %1167 = vmatprep.subr.bf16.mxu0 %v1246_v0 }
  0x27   : > { %1158 = vmatmul.mubr.bf16.vlgmr.msra.gmra.mrb[0].mxu1 %v1363_v17 }
  0x28   : > { %1182 = vmatpush3.bf16.msra.mxu1 %v1228_v28  ;;  %1197 = vmatprep.mubr.msk.bf16.mxu1 %vm1247_vm0, %v1246_v0 }
  0x29   : > { %1168 = vmatpush3.bf16.msra.mxu0 %v1224_v25  ;;  %1183 = vmatprep.subr.bf16.mxu1 %v1246_v0 }
  0x2a   : > { %1169 = vmatprep.subr.bf16.mxu0 %v1246_v0 }
  0x2c   : > { %1184 = vmatpush3.bf16.msra.mxu1 %v1230_v31 }
  0x2d   : > { %1170 = vmatpush3.bf16.msra.mxu0 %v1226_v27  ;;  %1185 = vmatprep.subr.bf16.mxu1 %v1246_v0 }
  0x2e   : > { %1171 = vmatprep.subr.bf16.mxu0 %v1246_v0 }
  0x30   : > { %1186 = vmatpush3.bf16.msra.mxu1 %v1232_v33 }
  0x31   : > { %1172 = vmatpush3.bf16.msra.mxu0 %v1227_v29  ;;  %1187 = vmatprep.subr.bf16.mxu1 %v1246_v0 }
  0x32   : > { %1173 = vmatprep.subr.bf16.mxu0 %v1246_v0 }
  0x34   : > { %1188 = vmatpush3.bf16.msra.mxu1 %v1233_v34 }
  0x35   : > { %1174 = vmatpush3.bf16.msra.mxu0 %v1229_v30  ;;  %1189 = vmatprep.subr.bf16.mxu1 %v1246_v0 }
  0x36   : > { %1175 = vmatprep.subr.bf16.mxu0 %v1246_v0 }
  0x38   : > { %1190 = vmatpush3.bf16.msra.mxu1 %v1234_v35 }
  0x39   : > { %1176 = vmatpush3.bf16.msra.mxu0 %v1231_v32  ;;  %1191 = vmatprep.subr.bf16.mxu1 %v1246_v0 }
  0x3c   : > { %1192 = vmatpush3.bf16.msra.mxu1 %v1235_v36 }
  0x3d   : > { %1193 = vmatprep.subr.bf16.mxu1 %v1246_v0 }
  0x40   : > { %1194 = vmatpush3.bf16.msra.mxu1 %v1236_v37 }
  0x41   : > { %1195 = vmatprep.subr.bf16.mxu1 %v1246_v0 }
  0x44   : > { %1196 = vmatpush3.bf16.msra.mxu1 %v1237_v38 }
  0x47   : > { %1198 = vmatmul.mubr.bf16.vlgmr.msra.gmra.mrb[4].mxu1 %v1363_v17 }
  0x91   : > { %v531_v39 = vpop.permute.xlu0 %530 }
  0x95   : > { %v536_v42 = vpop.permute.xlu0 %535 }
  0xef   : > { %v519_v40 = vpop.f32.mrb[0].mxu0 }
  0xf0   : > { %v1139_v41 = vpop.f32.mrb[1].mxu0  ;;  %v538_v44 = vmul.f32 %v531_v39, %v519_v40 }
  0xf1   : > { %v522_v43 = vpop.f32.mrb[2].mxu0 }
  0xf2   : > { %v539_v45 = vmul.f32 %v536_v42, %v522_v43  ;;  %v1140_v46 = vpop.f32.mrb[3].mxu0 }
  0xf4   : > { %v540_v47 = vpack.c.bf16 %v539_v45, %v538_v44 }
  0xf6   : > { %1178 = vmatmul.mubr.bf16.vlgmr.msra.gmra.mrb[4].mxu0 %v540_v47 }
  0xfa   : > { %v655_v48 = vpop.f32.mrb[0].mxu1 }
  0xfb   : > { %v1159_v49 = vpop.f32.mrb[1].mxu1 }
  0xfc   : > { %v658_v50 = vpop.f32.mrb[2].mxu1 }
  0xfd   : > { %v1160_v51 = vpop.f32.mrb[3].mxu1 }
 0x11a   : > { %v889_v52 = vpop.f32.mrb[4].mxu1 }
 0x11b   : > { %v1199_v53 = vpop.f32.mrb[5].mxu1  ;;  %896 = vst [vmem:[%s449_s22] sm:$0xff] %v889_v52 }
 0x11c   : > { %v892_v54 = vpop.f32.mrb[6].mxu1 }
 0x11d   : > { %v1200_v55 = vpop.f32.mrb[7].mxu1  ;;  %897 = vst [vmem:[%s449_s22 + $0x8] sm:$0xff] %v892_v54 }
 0x1c9   : > { %v744_v56 = vpop.f32.mrb[4].mxu0 }
 0x1ca   : > { %v745_v58 = vadd.f32 %v744_v56, %v655_v48  ;;  %v1179_v59 = vpop.f32.mrb[5].mxu0 }
 0x1cb   : > { %v747_v60 = vpop.f32.mrb[6].mxu0 }
 0x1cc   : > { %v758_v61 = vadd.f32 %v1077_v57, %v745_v58  ;;  %v748_v62 = vadd.f32 %v747_v60, %v658_v50  ;;  %v1180_v63 = vpop.f32.mrb[7].mxu0 }
 0x1ce   : > { %v760_v0 = vmax.f32 %v758_v61, 0.0  ;;  %v759_v1 = vadd.f32 %v1077_v57, %v748_v62 }
 0x1d0   : > { %v761_v2 = vmax.f32 %v759_v1, 0.0  ;;  %v779_v3 = vmul.f32 %v760_v0, %v760_v0 }
 0x1d2   : > { %v1104_v4 = vpack.c.bf16 %v761_v2, %v760_v0  ;;  %v772_v5 = vadd.f32 %v761_v2, %v760_v0  ;;  %v780_v6 = vmul.f32 %v761_v2, %v761_v2 }
 0x1d4   : > { %1105 = vst [vmem:[%s440_s26] sm:$0xff] %v1104_v4   ;;  %v773_v7 = vrot.slane %v772_v5, 4  ;;  %v781_v8 = vadd.f32 %v780_v6, %v779_v3 }
 0x1d6   : > { %v774_v9 = vadd.f32 %v773_v7, %v772_v5  ;;  %v782_v10 = vrot.slane %v781_v8, 4 }
 0x1d8   : > { %v775_v11 = vrot.slane %v774_v9, 2  ;;  %v783_v12 = vadd.f32 %v782_v10, %v781_v8 }
 0x1da   : > { %v776_v13 = vadd.f32 %v775_v11, %v774_v9  ;;  %v784_v14 = vrot.slane %v783_v12, 2 }
 0x1dc   : > { %v777_v15 = vrot.slane %v776_v13, 1  ;;  %v785_v16 = vadd.f32 %v784_v14, %v783_v12 }
 0x1de   : > { %v786_v17 = vrot.slane %v785_v16, 1  ;;  %v778_v18 = vadd.f32 %v777_v15, %v776_v13 }
 0x1e0   : > { %v787_v19 = vadd.f32 %v786_v17, %v785_v16 }
 0x1e2   : > { %v789_v20 = vsel %vm788_vm2, %v778_v18, %v787_v19 }
 0x1e3   : > { %790 = vst [vmem:[%s444_s12] sm:$0x3] %v789_v20 }
 0x1e4 PF: > { %s22_s17 = sadd.s32 1, %s1244_s17  }
 0x1e5   : > { %p19_p4 = scmp.ge.s32.totalorder %s22_s17, 4  }
 0x1e7   :  { %21 = sbr.rel (!%p19_p4) target bundleno = 1 (0x1), region = 116 }

// kernel: gnn_forward.7
= control target key start
LH: loop header
LB: loop body
LE: loop exit
PB: predicated region body
PF: predicated region fallthrough
CT: control target
= control target key end

     0   :  { %11 = vsyncpa [#allocation3], 0  ;;  %s863_s0 = inlined_call_operand.vmem [shape: bf16[2,16,128], index: 0, kind: input, shape index: {}]   ;;  %s864_s1 = inlined_call_operand.vmem [shape: f32[2,16,128], index: 1, kind: input, shape index: {}]   ;;  %s865_s2 = inlined_call_operand.vmem [shape: f32[1,128], index: 2, kind: input, shape index: {}]   ;;  %s866_s3 = inlined_call_operand.vmem [shape: f32[1,128], index: 3, kind: input, shape index: {}]   ;;  %s867_s4 = inlined_call_operand.vmem [shape: bf16[128,128], index: 4, kind: input, shape index: {}]   ;;  %s868_s5 = inlined_call_operand.vmem [shape: f32[1,128], index: 5, kind: input, shape index: {}]   ;;  %s869_s6 = inlined_call_operand.hbm [shape: f32[2,16,128], index: 6, kind: output, shape index: {}]  }
   0x1   :  { %13 = vsyncpa [#allocation3 + $0x1], 0  ;;  %s720_s21 = smov 0   ;;  %s722_s22 = smov 0  }
   0x2   :  { %s724_s23 = smov 0   ;;  %s726_s24 = smov 0  }
   0x3 LB: > { %s741_s25 = sadd.s32 4294967295, %s678_s24   ;;  %s504_s26 = sadd.s32 4294967294, %s678_s24   ;;  %s678_s24 = sphi %s726_s24, %s875_s24   ;;  %s674_s23 = sphi %s724_s23, %s874_s23   ;;  %s670_s22 = sphi %s722_s22, %s873_s22   ;;  %s666_s21 = sphi %s720_s21, %s872_s21  }
   0x4   : > { %s745_s27 = sadd.s32 1, %s678_s24   ;;  %s162_s28 = sadd.s32 1, %s674_s23 }
   0x5   : > { %s159_s29 = ssub.s32 %s678_s24, %s745_s27  ;;  %p172_p0 = scmp.ne.s32.totalorder %s674_s23, %s670_s22 }
   0x6   : > { %p160_p1 = scmp.eq.s32.totalorder %s159_s29, 0  ;;  %p173_p2 = scmp.eq.s32.totalorder %s741_s25, 1 }
   0x7   : > { %p178_p3 = scmp.ne.s32.totalorder %s670_s22, %s666_s21  ;;  %p179_p4 = scmp.eq.s32.totalorder %s504_s26, 1 }
   0x8   : > { %s756_s30 = scalar_select %p160_p1, %s674_s23, %s162_s28  }
   0x9   : > { %p758_p5 = por %p173_p2, %p172_p0  ;;  %p762_p6 = por %p179_p4, %p178_p3 }
   0xa   : > { %p507_p7 = scmp.ge.s32.totalorder %s678_s24, 1  ;;  %p225_p8 = scmp.lt.s32.totalorder %s678_s24, 3 }
   0xc   : > { %p226_p9 = pnand %p507_p7, %p225_p8 }
   0xd   : > { %v608_v0 = vld [vmem:[%s867_s4] sm:$0xff] (!%p226_p9)   ;;  %v680_v1 = vmov (!%p226_p9), 0.0   ;;  %v609_v2 = vld [vmem:[%s867_s4 + $0x8] sm:$0xff] (!%p226_p9)   ;;  %vm681_vm0 = vmmov (!%p226_p9), 0   ;;  %p260_p10 = scmp.lt.s32.totalorder (!%p226_p9), %s741_s25, 1  ;;  %v610_v3 = vld [vmem:[%s867_s4 + $0x10] sm:$0xff] (!%p226_p9)  }
   0xe   : > { %229 = sbr.rel (%p226_p9) target bundleno = 281 (0x119), region = 44  ;;  %545 = vmatprep.subr.bf16.mxu0 (!%p226_p9), %v680_v1  ;;  %561 = vmatprep.mubr.msk.bf16.mxu0 (!%p226_p9), %vm681_vm0, %v680_v1  ;;  %v611_v4 = vld [vmem:[%s867_s4 + $0x18] sm:$0xff] (!%p226_p9)   ;;  %v612_v5 = vld [vmem:[%s867_s4 + $0x20] sm:$0xff] (!%p226_p9)   ;;  %v613_v9 = vld [vmem:[%s867_s4 + $0x28] sm:$0xff] (!%p226_p9)   ;;  %s531_s15 = sshll.u32 (!%p226_p9), %s741_s25, 8 }
   0xf   : > { %546 = vmatpush3.bf16.msra.mxu0 (!%p226_p9), %v608_v0  ;;  %v513_v10 = vld [vmem:[%s865_s2] ss:$0 sm:$0xff] (!%p226_p9)  ;;  %v614_v13 = vld [vmem:[%s867_s4 + $0x30] sm:$0xff] (!%p226_p9)   ;;  %v615_v17 = vld [vmem:[%s867_s4 + $0x38] sm:$0xff] (!%p226_p9)   ;;  %s820_s18 = scalar_lea.hbm (!%p226_p9), %s869_s6, %s531_s15 }
  0x10   : > { %547 = vmatprep.subr.bf16.mxu0 (!%p226_p9), %v680_v1  ;;  %v514_v14 = vld [vmem:[%s866_s3] ss:$0 sm:$0xff] (!%p226_p9) }
  0x11   : > { %v523_v21 = vld [vmem:[%s868_s5] ss:$0 sm:$0xff] (!%p226_p9) }
  0x13   : > { %548 = vmatpush3.bf16.msra.mxu0 (!%p226_p9), %v609_v2 }
  0x14   : > { %549 = vmatprep.subr.bf16.mxu0 (!%p226_p9), %v680_v1 }
  0x15   : > { %s776_s13 = scalar_select %p260_p10, %s741_s25, 1 }
  0x16   : > { %s682_s25 = smov [#allocation2]  }
  0x17   : > { %s529_s16 = sshll.u32 %s776_s13, 3  ;;  %550 = vmatpush3.bf16.msra.mxu0 %v610_v3  ;;  %s530_s20 = sshll.u32 %s776_s13, 4 }
  0x18   : > { %551 = vmatprep.subr.bf16.mxu0 %v680_v1  ;;  %s264_s26 = scalar_lea.vmem %s863_s0, %s529_s16  ;;  %s269_s9 = scalar_lea.vmem %s864_s1, %s530_s20 }
  0x19   : > { %v533_v6 = vld [vmem:[%s264_s26] sm:$0xff]   ;;  %s257_s26 = sand.u32 1, %s670_s22   ;;  %v295_v22 = vld [vmem:[%s269_s9 + $0x8] sm:$0xff]  ;;  %s620_s28 = sshll.u32 %s682_s25, 4  ;;  %s621_s28 = int_to_ptr.vmem [resolvable:$false] %s620_s28 }
  0x1a   : > { %v534_v7 = vunpack.c.l.bf16 %v533_v6  ;;  %v535_v8 = vunpack.c.h.bf16 %v533_v6  ;;  %s508_s10 = sshll.u32 %s257_s26, 4  ;;  %v294_v19 = vld [vmem:[%s269_s9] sm:$0xff]  ;;  %s822_s19 = scalar_lea.sflag [#allocation3], %s257_s26 }
  0x1b   : > { %552 = vmatpush3.bf16.msra.mxu0 %v611_v4  ;;  %s259_s13 = scalar_lea.vmem [#allocation2], %s508_s10  ;;  %s622_s29 = scalar_lea.vmem %s621_s28, 512 }
  0x1c   : > { %553 = vmatprep.subr.bf16.mxu0 %v680_v1  ;;  %v282_v11 = vmul.f32 %v534_v7, %v513_v10  ;;  %v283_v12 = vmul.f32 %v535_v8, %v513_v10  ;;  %s430_s14 = sshll.u32 %s259_s13, 4  ;;  %s815_s14 = int_to_ptr.vmem [resolvable:$true] %s430_s14 }
  0x1d   : > { %s616_s20 = scalar_lea.vmem %s815_s14, 256  ;;  %p623_p0 = scmp.lt.s32.totalorder %s815_s14, %s621_s28 }
  0x1e   : > { %v291_v15 = vadd.f32 %v514_v14, %v282_v11  ;;  %v292_v16 = vadd.f32 %v514_v14, %v283_v12  ;;  %p617_p11 = scmp.ne.s32.totalorder %s815_s14, %s616_s20  ;;  %p624_p1 = scmp.lt.s32.totalorder %s622_s29, %s616_s20 }
  0x1f   : > { %554 = vmatpush3.bf16.msra.mxu0 %v612_v5 }
  0x20   : > { %555 = vmatprep.subr.bf16.mxu0 %v680_v1  ;;  %v293_v18 = vpack.c.bf16 %v292_v16, %v291_v15  ;;  %p618_p12 = pnand %p617_p11, %p758_p5  ;;  %p625_p2 = por %p624_p1, %p623_p0 }
  0x22   : > { %p619_p13 = pneg %p618_p12 }
  0x23   : > { %556 = vmatpush3.bf16.msra.mxu0 %v613_v9 }
  0x24   : > { %557 = vmatprep.subr.bf16.mxu0 %v680_v1  ;;  %p626_p3 = pnand %p625_p2, %p619_p13 }
  0x27   : > { %558 = vmatpush3.bf16.msra.mxu0 %v614_v13 }
  0x28   : > { %559 = vmatprep.subr.bf16.mxu0 %v680_v1 }
  0x2b   : > { %560 = vmatpush3.bf16.msra.mxu0 %v615_v17 }
  0x2e   : > { %562 = vmatmul.mubr.bf16.vlgmr.msra.gmra.mrb[0].mxu0 %v293_v18 }
 0x101   : > { %v394_v20 = vpop.f32.mrb[0].mxu0 }
 0x102   : > { %v401_v23 = vadd.f32 %v394_v20, %v294_v19  ;;  %v563_v24 = vpop.f32.mrb[1].mxu0 }
 0x103   : > { %v397_v25 = vpop.f32.mrb[2].mxu0 }
 0x104   : > { %v410_v26 = vadd.f32 %v523_v21, %v401_v23  ;;  %v402_v27 = vadd.f32 %v397_v25, %v295_v22  ;;  %v564_v28 = vpop.f32.mrb[3].mxu0 }
 0x106   : > { %v412_v29 = vmax.f32 %v410_v26, 0.0  ;;  %v411_v30 = vadd.f32 %v523_v21, %v402_v27 }
 0x108   : > { %414 = vst [vmem:[%s259_s13] sm:$0xff] %v412_v29  ;;  %v413_v31 = vmax.f32 %v411_v30, 0.0 }
 0x10a   : > { %415 = vst [vmem:[%s259_s13 + $0x8] sm:$0xff] %v413_v31 }
 0x10b   : > { %629 = shalt.err (!%p626_p3)
}
 0x10c   : > { %s630_s26 = scalar_lea.hbm %s820_s18, 256  ;;  %s634_s11 = scalar_lea.hbm %s869_s6, 512 }
 0x10d   : > { %p631_p4 = scmp.ne.s32.totalorder %s820_s18, %s630_s26  ;;  %p635_p9 = scmp.lt.u32.totalorder %s820_s18, %s869_s6 }
 0x10e   : > { %p636_p10 = scmp.lt.u32.totalorder %s634_s11, %s630_s26  ;;  %p638_p12 = scmp.lt.u32.totalorder %s630_s26, %s820_s18 }
 0x10f   : > { %p632_p7 = pnand %p631_p4, %p758_p5 }
 0x110   : > { %p637_p11 = por %p636_p10, %p635_p9 }
 0x111   : > { %p633_p8 = pneg %p632_p7 }
 0x112   : > { %p639_p13 = por %p638_p12, %p637_p11 }
 0x114   : > { %p640_p0 = pnand %p639_p13, %p633_p8 }
 0x116   : > { %643 = shalt.err (!%p640_p0)
}
 0x117   : > { %s683_s15 = smov 128   ;;  %s684_s16 = smov 8  }
 0x118   : > { %565 = dma.vmem_to_hbm [thread:$0]  (%p758_p5), %s815_s14, 256, %s820_s18, %s822_s19, %s683_s15, %s683_s15, %s684_s16  }
 0x119 PF: > { %p571_p1 = scmp.ge.s32.totalorder %s678_s24, 2  ;;  %s445_s17 = sand.u32 1, %s666_s21  }
 0x11a   : > { %s446_s20 = scalar_lea.sflag [#allocation3], %s445_s17 }
 0x11b   : > { %p568_p2 = pnand %p571_p1, %p762_p6 }
 0x11d   : > { %661 = dma.done.wait (!%p568_p2), %s446_s20, 256  }
 0x11e   : > { %663 = vsyncadd (!%p568_p2), %s446_s20, 4294967040  ;;  %p16_p3 = scmp.ge.s32.totalorder %s745_s27, 4   ;;  %s872_s21 = smov %s670_s22 }
 0x11f   : > { %s873_s22 = smov %s674_s23  ;;  %s874_s23 = smov %s756_s30 }
 0x120   : > { %s875_s24 = smov %s745_s27  ;;  %18 = sbr.rel (!%p16_p3) target bundleno = 3 (0x3), region = 82 }
 0x127   :  { %451 = vsyncpa [#allocation3], 1 }
 0x128   :  { %453 = vsyncpa [#allocation3 + $0x1], 1 }

// kernel: gnn_forward.6
= control target key start
LH: loop header
LB: loop body
LE: loop exit
PB: predicated region body
PF: predicated region fallthrough
CT: control target
= control target key end

     0   :  { %s1378_s21 = smov 0   ;;  %s1544_s0 = inlined_call_operand.vmem [shape: bf16[2,16,128], index: 0, kind: input, shape index: {}]   ;;  %s1545_s1 = inlined_call_operand.vmem [shape: bf16[2,16,16], index: 1, kind: input, shape index: {}]   ;;  %s1546_s2 = inlined_call_operand.vmem [shape: f32[2,16,1], index: 2, kind: input, shape index: {}]   ;;  %s1547_s3 = inlined_call_operand.vmem [shape: f32[1,128], index: 3, kind: input, shape index: {}]   ;;  %s1548_s4 = inlined_call_operand.vmem [shape: f32[1,128], index: 4, kind: input, shape index: {}]   ;;  %s1549_s5 = inlined_call_operand.vmem [shape: bf16[128,128], index: 5, kind: input, shape index: {}]   ;;  %s1550_s6 = inlined_call_operand.vmem [shape: bf16[128,128], index: 6, kind: input, shape index: {}]   ;;  %s1551_s7 = inlined_call_operand.vmem [shape: f32[1,128], index: 7, kind: input, shape index: {}]   ;;  %s1552_s8 = inlined_call_operand.vmem [shape: bf16[128,128], index: 8, kind: input, shape index: {}]   ;;  %s1553_s9 = inlined_call_operand.vmem [shape: f32[2,16,128], index: 9, kind: input, shape index: {}]   ;;  %s1554_s10 = inlined_call_operand.vmem [shape: bf16[2,16,128], index: 10, kind: output, shape index: {0}]   ;;  %s1555_s11 = inlined_call_operand.vmem [shape: f32[2,2,128], index: 11, kind: output, shape index: {1}]   ;;  %s1556_s12 = inlined_call_operand.vmem [shape: f32[2,16,128], index: 12, kind: output, shape index: {2}]  }
   0x1 LB: > { %s1102_s22 = sadd.s32 4294967295, %s1308_s21   ;;  %p1106_p0 = scmp.ge.s32.totalorder %s1308_s21, 1  ;;  %s1308_s21 = sphi %s1378_s21, %s23_s21  }
   0x2   : > { %p397_p1 = scmp.lt.s32.totalorder %s1308_s21, 3 }
   0x4   : > { %p398_p2 = pnand %p1106_p0, %p397_p1 }
   0x5   : > { %p463_p3 = scmp.lt.s32.totalorder (!%p398_p2), %s1102_s22, 1  ;;  %v1310_v0 = vmov (!%p398_p2), 0.0   ;;  %v1278_v1 = vld [vmem:[%s1550_s6] sm:$0xff] (!%p398_p2)   ;;  %vm1311_vm0 = vmmov (!%p398_p2), 0   ;;  %v1312_v2 = vmov (!%p398_p2), 0   ;;  %v1279_v3 = vld [vmem:[%s1550_s6 + $0x8] sm:$0xff] (!%p398_p2)  }
   0x6   : > { %401 = sbr.rel (%p398_p2) target bundleno = 484 (0x1e4), region = 60  ;;  %1199 = vmatprep.subr.bf16.mxu0 (!%p398_p2), %v1310_v0  ;;  %1205 = vmatprep.subr.bf16.mxu1 (!%p398_p2), %v1310_v0  ;;  %v1120_v4 = vld [vmem:[%s1547_s3] ss:$0 sm:$0xff] (!%p398_p2)  ;;  %v1280_v9 = vld [vmem:[%s1550_s6 + $0x10] sm:$0xff] (!%p398_p2)   ;;  %v1281_v16 = vld [vmem:[%s1550_s6 + $0x18] sm:$0xff] (!%p398_p2)   ;;  %vm528_vm1 = vcmask (!%p398_p2), 130048  }
   0x7   : > { %1201 = vmatprep.mubr.msk.bf16.mxu0 (!%p398_p2), %vm1311_vm0, %v1310_v0  ;;  %1276 = vset.pattern.permute.xlu0 (!%p398_p2), %v1312_v2  ;;  %v1121_v10 = vld [vmem:[%s1548_s4] ss:$0 sm:$0xff] (!%p398_p2)  ;;  %v1284_v21 = vld [vmem:[%s1549_s5 + $0x8] sm:$0xff] (!%p398_p2)   ;;  %v1286_v23 = vld [vmem:[%s1549_s5 + $0x10] sm:$0xff] (!%p398_p2)   ;;  %vm835_vm2 = vcmask (!%p398_p2), 1040384  }
   0x8   : > { %1206 = vmatpush3.bf16.msra.mxu1 (!%p398_p2), %v1278_v1  ;;  %1221 = vmatprep.mubr.msk.bf16.mxu1 (!%p398_p2), %vm1311_vm0, %v1310_v0  ;;  %v1282_v19 = vld [vmem:[%s1549_s5] sm:$0xff] (!%p398_p2)   ;;  %v1285_v22 = vld [vmem:[%s1550_s6 + $0x28] sm:$0xff] (!%p398_p2)   ;;  %v1287_v24 = vld [vmem:[%s1550_s6 + $0x30] sm:$0xff] (!%p398_p2)  }
   0x9   : > { %1207 = vmatprep.subr.bf16.mxu1 (!%p398_p2), %v1310_v0  ;;  %v1283_v20 = vld [vmem:[%s1550_s6 + $0x20] sm:$0xff] (!%p398_p2)   ;;  %v1288_v25 = vld [vmem:[%s1549_s5 + $0x18] sm:$0xff] (!%p398_p2)   ;;  %v1292_v29 = vld [vmem:[%s1549_s5 + $0x28] sm:$0xff] (!%p398_p2)  }
   0xa   : > { %v1289_v26 = vld [vmem:[%s1550_s6 + $0x38] sm:$0xff] (!%p398_p2)   ;;  %v1290_v27 = vld [vmem:[%s1549_s5 + $0x20] sm:$0xff] (!%p398_p2)   ;;  %v1293_v30 = vld [vmem:[%s1552_s8 + $0x8] sm:$0xff] (!%p398_p2)  }
   0xb   : > { %v1291_v28 = vld [vmem:[%s1552_s8] sm:$0xff] (!%p398_p2)   ;;  %v1294_v31 = vld [vmem:[%s1549_s5 + $0x30] sm:$0xff] (!%p398_p2)   ;;  %v1296_v33 = vld [vmem:[%s1549_s5 + $0x38] sm:$0xff] (!%p398_p2)  }
   0xc   : > { %1208 = vmatpush3.bf16.msra.mxu1 (!%p398_p2), %v1279_v3  ;;  %v1295_v32 = vld [vmem:[%s1552_s8 + $0x10] sm:$0xff] (!%p398_p2)   ;;  %v1297_v34 = vld [vmem:[%s1552_s8 + $0x18] sm:$0xff] (!%p398_p2)   ;;  %v1298_v35 = vld [vmem:[%s1552_s8 + $0x20] sm:$0xff] (!%p398_p2)  }
   0xd   : > { %s1558_s22 = smov (!%p463_p3, %s1102_s22), 1  ;;  %1209 = vmatprep.subr.bf16.mxu1 %v1310_v0  ;;  %v1299_v36 = vld [vmem:[%s1552_s8 + $0x28] sm:$0xff]   ;;  %v1300_v37 = vld [vmem:[%s1552_s8 + $0x30] sm:$0xff]   ;;  %v1301_v38 = vld [vmem:[%s1552_s8 + $0x38] sm:$0xff]  }
   0xe   : > { %s1401_s27 = sshll.u32 %s1558_s22, 3  ;;  %s1407_s30 = sshll.u32 %s1558_s22, 4  ;;  %v1140_v61 = vld [vmem:[%s1551_s7] ss:$0 sm:$0xff] }
   0xf   : > { %s467_s15 = scalar_lea.vmem %s1544_s0, %s1401_s27  ;;  %s472_s18 = scalar_lea.vmem %s1545_s1, %s1401_s27 }
  0x10   : > { %v1162_v5 = vld [vmem:[%s467_s15] sm:$0xff]   ;;  %s477_s23 = scalar_lea.vmem %s1546_s2, %s1407_s30  ;;  %1210 = vmatpush3.bf16.msra.mxu1 %v1280_v9  ;;  %s482_s14 = scalar_lea.vmem %s1553_s9, %s1407_s30 }
  0x11   : > { %v1163_v6 = vunpack.c.l.bf16 %v1162_v5  ;;  %v1164_v7 = vunpack.c.h.bf16 %v1162_v5  ;;  %v573_v8 = vld [vmem:[%s477_s23] sm:$0xff]  ;;  %v574_v13 = vld [vmem:[%s477_s23 + $0x8] sm:$0xff]  ;;  %1211 = vmatprep.subr.bf16.mxu1 %v1310_v0  ;;  %s496_s17 = scalar_lea.vmem %s1556_s12, %s1407_s30  ;;  %s487_s30 = scalar_lea.vmem %s1554_s10, %s1401_s27 }
  0x12   : > { %577 = vperm.xlu0 %1276, %v573_v8   ;;  %v1277_v18 = vld [vmem:[%s472_s18] sm:$0xff]   ;;  %v855_v56 = vld [vmem:[%s482_s14 + $0x8] sm:$0xff]  ;;  %s1117_s24 = sshll.u32 %s1558_s22, 1 }
  0x13   : > { %v509_v11 = vmul.f32 %v1163_v6, %v1120_v4  ;;  %v510_v12 = vmul.f32 %v1164_v7, %v1120_v4  ;;  %v854_v55 = vld [vmem:[%s482_s14] sm:$0xff]  ;;  %s491_s26 = scalar_lea.vmem %s1555_s11, %s1117_s24 }
  0x14   : > { %1212 = vmatpush3.bf16.msra.mxu1 %v1281_v16 }
  0x15   : > { %v518_v14 = vadd.f32 %v1121_v10, %v509_v11  ;;  %v519_v15 = vadd.f32 %v1121_v10, %v510_v12  ;;  %1213 = vmatprep.subr.bf16.mxu1 %v1310_v0 }
  0x16   : > { %582 = vperm.xlu0 %1276, %v574_v13  }
  0x17   : > { %v1433_v17 = vpack.c.bf16 %v519_v15, %v518_v14 }
  0x18   : > { %1214 = vmatpush3.bf16.msra.mxu1 %v1283_v20 }
  0x19   : > { %1200 = vmatpush3.bf16.msra.mxu0 %v1433_v17  ;;  %1215 = vmatprep.subr.bf16.mxu1 %v1310_v0 }
  0x1a   : > { %1225 = vmatprep.subr.bf16.mxu0 %v1310_v0 }
  0x1c   : > { %1202 = vmatmul.mubr.msk.bf16.vlgmr.msra.gmra.mrb[0].mxu0 %vm528_vm1, %v1277_v18  ;;  %1216 = vmatpush3.bf16.msra.mxu1 %v1285_v22 }
  0x1d   : > { %1226 = vmatpush3.bf16.msra.mxu0 %v1282_v19  ;;  %1241 = vmatprep.mubr.msk.bf16.mxu0 %vm1311_vm0, %v1310_v0 }
  0x1e   : > { %1227 = vmatprep.subr.bf16.mxu0 %v1310_v0  ;;  %1217 = vmatprep.subr.bf16.mxu1 %v1310_v0 }
  0x20   : > { %1218 = vmatpush3.bf16.msra.mxu1 %v1287_v24 }
  0x21   : > { %1228 = vmatpush3.bf16.msra.mxu0 %v1284_v21  ;;  %1219 = vmatprep.subr.bf16.mxu1 %v1310_v0 }
  0x22   : > { %1229 = vmatprep.subr.bf16.mxu0 %v1310_v0 }
  0x24   : > { %1220 = vmatpush3.bf16.msra.mxu1 %v1289_v26 }
  0x25   : > { %1230 = vmatpush3.bf16.msra.mxu0 %v1286_v23  ;;  %1245 = vmatprep.subr.bf16.mxu1 %v1310_v0 }
  0x26   : > { %1231 = vmatprep.subr.bf16.mxu0 %v1310_v0 }
  0x27   : > { %1222 = vmatmul.mubr.bf16.vlgmr.msra.gmra.mrb[0].mxu1 %v1433_v17 }
  0x28   : > { %1246 = vmatpush3.bf16.msra.mxu1 %v1291_v28  ;;  %1261 = vmatprep.mubr.msk.bf16.mxu1 %vm1311_vm0, %v1310_v0 }
  0x29   : > { %1232 = vmatpush3.bf16.msra.mxu0 %v1288_v25  ;;  %1247 = vmatprep.subr.bf16.mxu1 %v1310_v0 }
  0x2a   : > { %1233 = vmatprep.subr.bf16.mxu0 %v1310_v0 }
  0x2c   : > { %1248 = vmatpush3.bf16.msra.mxu1 %v1293_v30 }
  0x2d   : > { %1234 = vmatpush3.bf16.msra.mxu0 %v1290_v27  ;;  %1249 = vmatprep.subr.bf16.mxu1 %v1310_v0 }
  0x2e   : > { %1235 = vmatprep.subr.bf16.mxu0 %v1310_v0 }
  0x30   : > { %1250 = vmatpush3.bf16.msra.mxu1 %v1295_v32 }
  0x31   : > { %1236 = vmatpush3.bf16.msra.mxu0 %v1292_v29  ;;  %1251 = vmatprep.subr.bf16.mxu1 %v1310_v0 }
  0x32   : > { %1237 = vmatprep.subr.bf16.mxu0 %v1310_v0 }
  0x34   : > { %1252 = vmatpush3.bf16.msra.mxu1 %v1297_v34 }
  0x35   : > { %1238 = vmatpush3.bf16.msra.mxu0 %v1294_v31  ;;  %1253 = vmatprep.subr.bf16.mxu1 %v1310_v0 }
  0x36   : > { %1239 = vmatprep.subr.bf16.mxu0 %v1310_v0 }
  0x38   : > { %1254 = vmatpush3.bf16.msra.mxu1 %v1298_v35 }
  0x39   : > { %1240 = vmatpush3.bf16.msra.mxu0 %v1296_v33  ;;  %1255 = vmatprep.subr.bf16.mxu1 %v1310_v0 }
  0x3c   : > { %1256 = vmatpush3.bf16.msra.mxu1 %v1299_v36 }
  0x3d   : > { %1257 = vmatprep.subr.bf16.mxu1 %v1310_v0 }
  0x40   : > { %1258 = vmatpush3.bf16.msra.mxu1 %v1300_v37 }
  0x41   : > { %1259 = vmatprep.subr.bf16.mxu1 %v1310_v0 }
  0x44   : > { %1260 = vmatpush3.bf16.msra.mxu1 %v1301_v38 }
  0x47   : > { %1262 = vmatmul.mubr.bf16.vlgmr.msra.gmra.mrb[4].mxu1 %v1433_v17 }
  0x91   : > { %v578_v39 = vpop.permute.xlu0 %577 }
  0x95   : > { %v583_v42 = vpop.permute.xlu0 %582 }
  0xef   : > { %v566_v40 = vpop.f32.mrb[0].mxu0 }
  0xf0   : > { %v1203_v41 = vpop.f32.mrb[1].mxu0  ;;  %v585_v44 = vmul.f32 %v578_v39, %v566_v40 }
  0xf1   : > { %v569_v43 = vpop.f32.mrb[2].mxu0 }
  0xf2   : > { %v586_v45 = vmul.f32 %v583_v42, %v569_v43  ;;  %v1204_v46 = vpop.f32.mrb[3].mxu0 }
  0xf4   : > { %v587_v47 = vpack.c.bf16 %v586_v45, %v585_v44 }
  0xf6   : > { %1242 = vmatmul.mubr.bf16.vlgmr.msra.gmra.mrb[4].mxu0 %v587_v47 }
  0xfa   : > { %v702_v48 = vpop.f32.mrb[0].mxu1 }
  0xfb   : > { %v1223_v49 = vpop.f32.mrb[1].mxu1 }
  0xfc   : > { %v705_v50 = vpop.f32.mrb[2].mxu1 }
  0xfd   : > { %v1224_v51 = vpop.f32.mrb[3].mxu1 }
 0x11a   : > { %v938_v52 = vpop.f32.mrb[4].mxu1 }
 0x11b   : > { %v1263_v53 = vpop.f32.mrb[5].mxu1  ;;  %v939_v58 = vadd.f32 %v938_v52, %v854_v55 }
 0x11c   : > { %v941_v54 = vpop.f32.mrb[6].mxu1 }
 0x11d   : > { %v1264_v57 = vpop.f32.mrb[7].mxu1  ;;  %v942_v59 = vadd.f32 %v941_v54, %v855_v56  ;;  %945 = vst [vmem:[%s496_s17] sm:$0xff] %v939_v58 }
 0x11f   : > { %946 = vst [vmem:[%s496_s17 + $0x8] sm:$0xff] %v942_v59 }
 0x1c9   : > { %v791_v60 = vpop.f32.mrb[4].mxu0 }
 0x1ca   : > { %v792_v62 = vadd.f32 %v791_v60, %v702_v48  ;;  %v1243_v63 = vpop.f32.mrb[5].mxu0 }
 0x1cb   : > { %v794_v0 = vpop.f32.mrb[6].mxu0 }
 0x1cc   : > { %v805_v1 = vadd.f32 %v1140_v61, %v792_v62  ;;  %v795_v2 = vadd.f32 %v794_v0, %v705_v50  ;;  %v1244_v3 = vpop.f32.mrb[7].mxu0 }
 0x1ce   : > { %v807_v4 = vmax.f32 %v805_v1, 0.0  ;;  %v806_v5 = vadd.f32 %v1140_v61, %v795_v2 }
 0x1d0   : > { %v808_v6 = vmax.f32 %v806_v5, 0.0  ;;  %v826_v7 = vmul.f32 %v807_v4, %v807_v4 }
 0x1d2   : > { %v1168_v8 = vpack.c.bf16 %v808_v6, %v807_v4  ;;  %v819_v9 = vadd.f32 %v808_v6, %v807_v4  ;;  %v827_v10 = vmul.f32 %v808_v6, %v808_v6 }
 0x1d4   : > { %1169 = vst [vmem:[%s487_s30] sm:$0xff] %v1168_v8   ;;  %v820_v11 = vrot.slane %v819_v9, 4  ;;  %v828_v12 = vadd.f32 %v827_v10, %v826_v7 }
 0x1d6   : > { %v821_v13 = vadd.f32 %v820_v11, %v819_v9  ;;  %v829_v14 = vrot.slane %v828_v12, 4 }
 0x1d8   : > { %v822_v15 = vrot.slane %v821_v13, 2  ;;  %v830_v16 = vadd.f32 %v829_v14, %v828_v12 }
 0x1da   : > { %v823_v17 = vadd.f32 %v822_v15, %v821_v13  ;;  %v831_v18 = vrot.slane %v830_v16, 2 }
 0x1dc   : > { %v824_v19 = vrot.slane %v823_v17, 1  ;;  %v832_v20 = vadd.f32 %v831_v18, %v830_v16 }
 0x1de   : > { %v833_v21 = vrot.slane %v832_v20, 1  ;;  %v825_v22 = vadd.f32 %v824_v19, %v823_v17 }
 0x1e0   : > { %v834_v23 = vadd.f32 %v833_v21, %v832_v20 }
 0x1e2   : > { %v836_v24 = vsel %vm835_vm2, %v825_v22, %v834_v23 }
 0x1e3   : > { %837 = vst [vmem:[%s491_s26] sm:$0x3] %v836_v24 }
 0x1e4 PF: > { %s23_s21 = sadd.s32 1, %s1308_s21  }
 0x1e5   : > { %p20_p4 = scmp.ge.s32.totalorder %s23_s21, 4  }
 0x1e7   :  { %22 = sbr.rel (!%p20_p4) target bundleno = 1 (0x1), region = 123 }

</bundles_post_ra>
